<compile_context>
chip_gen: v5e
topology: v5e:2x2
jax: 0.10.0
libtpu: 0.0.40
codegen_flags: <defaults>
</compile_context>

<pallas_src>
import functools

import jax
import jax.numpy as jnp
from jax.experimental import pallas as pl
from jax.experimental.pallas import tpu as pltpu

EPS = 1e-5


# --------------------------------------------------------------------------- #
# Kernel helpers (operate on (C, D*M) f32 slabs)                               #
# --------------------------------------------------------------------------- #
def _batchnorm(y, g_ref, bb_ref):
    """Training-mode BatchNorm over a (C, L) slab — single-pass batch stats."""
    inv_n = 1.0 / y.shape[1]
    s = jnp.sum(y, axis=1, keepdims=True)
    ss = jnp.sum(y * y, axis=1, keepdims=True)
    mean = s * inv_n
    var = ss * inv_n - mean * mean               # biased variance (PyTorch fwd)
    scale = g_ref[...] * jax.lax.rsqrt(var + EPS)
    shift = bb_ref[...] - mean * scale
    return y * scale + shift


def _conv_s2(x, w_ref, d_in, d_out, m):
    """Conv3d(k=(3,1,1), stride=(2,1,1), pad=(1,0,0)) as ONE im2col matmul.

    x: (Cin, d_in*m) f32 slab.  w_ref: (Cout, 3*Cin) bf16, taps packed [W0|W1|W2].
    """
    xb = x.astype(jnp.bfloat16)
    c_in = x.shape[0]
    zero = jnp.zeros((c_in, m), jnp.bfloat16)
    taps = []
    for k in range(3):                                    # static: builds one concat
        blocks = []
        for do in range(d_out):
            di = 2 * do - 1 + k
            blocks.append(xb[:, di * m:(di + 1) * m] if 0 <= di < d_in else zero)
        taps.append(jnp.concatenate(blocks, axis=1))      # (Cin, d_out*m)
    p = jnp.concatenate(taps, axis=0)                     # (3*Cin, d_out*m)
    return jnp.dot(w_ref[...], p, preferred_element_type=jnp.float32)


def _convt_s2(x, we_ref, wo_ref, d_in, m):
    """ConvTranspose3d(k=(3,1,1), stride=(2,1,1), pad=(1,0,0)), even/odd split.

    x: (Cin, d_in*m) f32.  we: (Cout, Cin) = W1.  wo: (Cout, 2*Cin) = [W0|W2].
    Output depth d_out = 2*d_in - 1.
    """
    xb = x.astype(jnp.bfloat16)
    # even output depths 2*j  :  W1 @ x[j]   -> one slab-wide matmul
    y_even = jnp.dot(we_ref[...], xb, preferred_element_type=jnp.float32)
    # odd  output depths 2*j+1:  W0 @ x[j+1] + W2 @ x[j]  -> one packed matmul
    p_odd = jnp.concatenate([xb[:, m:], xb[:, :(d_in - 1) * m]], axis=0)
    y_odd = jnp.dot(wo_ref[...], p_odd, preferred_element_type=jnp.float32)
    # interleave even/odd depth blocks back into one lane-dense slab
    blocks = []
    for j in range(d_in - 1):
        blocks.append(y_even[:, j * m:(j + 1) * m])
        blocks.append(y_odd[:, j * m:(j + 1) * m])
    blocks.append(y_even[:, (d_in - 1) * m:])
    return jnp.concatenate(blocks, axis=1)                # (Cout, (2*d_in-1)*m)


def _g_model_kernel(p1_ref,
                    w1_ref, g1_ref, bb1_ref,
                    w2_ref, g2_ref, bb2_ref,
                    w3e_ref, w3o_ref, g3_ref, bb3_ref,
                    w4e_ref, w4o_ref, g4_ref, bb4_ref,
                    o_ref, *, m, d1, d2, d3):
    """Whole forward pass fused in one invocation (all operands fit in VMEM)."""
    # Layer 1: stride-2 conv; im2col operand prebuilt in the wrapper (layout glue).
    y = jnp.dot(w1_ref[...], p1_ref[...].astype(jnp.bfloat16),
                preferred_element_type=jnp.float32)       # (C1, d1*m)
    y = jnp.maximum(_batchnorm(y, g1_ref, bb1_ref), 0.0)

    # Layer 2: stride-2 conv, depth d1 -> d2.
    y = _conv_s2(y, w2_ref, d1, d2, m)
    y = jnp.maximum(_batchnorm(y, g2_ref, bb2_ref), 0.0)

    # Layer 3: stride-2 transposed conv, depth d2 -> d3 = 2*d2-1.
    y = _convt_s2(y, w3e_ref, w3o_ref, d2, m)
    y = jnp.maximum(_batchnorm(y, g3_ref, bb3_ref), 0.0)

    # Layer 4: stride-2 transposed conv, depth d3 -> d4 = 2*d3-1, then BN + tanh.
    y = _convt_s2(y, w4e_ref, w4o_ref, d3, m)
    y = _batchnorm(y, g4_ref, bb4_ref)

    # Single lane-dense store of the whole (Cout, d4*m) result.
    o_ref[...] = jnp.tanh(y).astype(o_ref.dtype)


# --------------------------------------------------------------------------- #
# Wrapper                                                                      #
# --------------------------------------------------------------------------- #
def g_model_forward(x, p):
    """x: (N, Cin, D, H, W) float32 (PyTorch NCDHW). Returns (N, Cout, D4, H, W)."""
    n, cin, d, h, w = x.shape
    m = n * h * w
    d1 = (d - 1) // 2 + 1
    d2 = (d1 - 1) // 2 + 1
    d3 = 2 * d2 - 1
    d4 = 2 * d3 - 1
    cout = p['w4'].shape[1]

    # NCDHW -> (Cin, D, M) slab; lanes are (n, h, w)-flattened, depth-major blocks.
    x_slab = jnp.transpose(x, (1, 2, 0, 3, 4)).reshape(cin, d, m)

    # Layer-1 im2col operand built wrapper-side (pure layout plumbing for XLA):
    # tap block k, depth block do holds x[:, 2*do-1+k, :] (zero-padded edges).
    xp = jnp.pad(x_slab, ((0, 0), (1, 1), (0, 0)))
    p1 = jnp.concatenate([xp[:, k:k + 2 * d1:2, :] for k in range(3)],
                         axis=0).reshape(3 * cin, d1 * m)

    # Pack conv weights for the im2col matmuls; bf16 is the native MXU format.
    bf = jnp.bfloat16
    wp1 = jnp.concatenate([p['w1'][k] for k in range(3)], axis=1).astype(bf)
    wp2 = jnp.concatenate([p['w2'][k] for k in range(3)], axis=1).astype(bf)
    w3e = p['w3'][1].astype(bf)
    w3o = jnp.concatenate([p['w3'][0], p['w3'][2]], axis=1).astype(bf)
    w4e = p['w4'][1].astype(bf)
    w4o = jnp.concatenate([p['w4'][0], p['w4'][2]], axis=1).astype(bf)
    # NOTE: conv biases b1..b4 are intentionally NOT passed — a per-channel
    # constant bias cancels exactly under the batch-stats BatchNorm that follows.

    # TODO(synk): v7x has 2 TensorCores — add a grid over the M = N*H*W lane axis
    #             with dimension_semantics=("parallel",) plus a two-phase
    #             (partial sum / sum-of-squares) BN reduction to use both cores.
    # TODO(synk): for non-toy H*W, tile M with BlockSpec pipelining (two-pass BN)
    #             and size the tiles from a 64 MiB (v7x) VMEM budget.
    vmem = pl.BlockSpec(memory_space=pltpu.MemorySpace.VMEM)
    kernel = functools.partial(_g_model_kernel, m=m, d1=d1, d2=d2, d3=d3)
    out_slab = pl.pallas_call(
        kernel,
        out_shape=jax.ShapeDtypeStruct((cout, d4 * m), jnp.float32),
        in_specs=[vmem] * 15,
        out_specs=vmem,
    )(p1,
      wp1, p['g1'], p['bb1'],
      wp2, p['g2'], p['bb2'],
      w3e, w3o, p['g3'], p['bb3'],
      w4e, w4o, p['g4'], p['bb4'])

    return jnp.transpose(out_slab.reshape(cout, d4, n, h, w), (2, 0, 1, 3, 4))


# --------------------------------------------------------------------------- #
# Parameters & reference                                                       #
# --------------------------------------------------------------------------- #
def init_params(key, in_channels, fil_num_g, out_channels):
    c1 = fil_num_g * 4
    c2 = fil_num_g * 8
    ks = jax.random.split(key, 8)
    scale = 0.1
    params = {
        # conv weights stored in tap-major layout (3, Cout, Cin)
        'w1': jax.random.normal(ks[0], (3, c1, in_channels), jnp.float32) * scale,
        'b1': jax.random.normal(ks[1], (c1, 1), jnp.float32) * scale,
        'w2': jax.random.normal(ks[2], (3, c2, c1), jnp.float32) * scale,
        'b2': jax.random.normal(ks[3], (c2, 1), jnp.float32) * scale,
        # ConvTranspose3d weights: PyTorch (Cin, Cout, 3) -> stored (3, Cout, Cin)
        'w3': jax.random.normal(ks[4], (3, c1, c2), jnp.float32) * scale,
        'b3': jax.random.normal(ks[5], (c1, 1), jnp.float32) * scale,
        'w4': jax.random.normal(ks[6], (3, out_channels, c1), jnp.float32) * scale,
        'b4': jax.random.normal(ks[7], (out_channels, 1), jnp.float32) * scale,
    }
    for name, c in (('1', c1), ('2', c2), ('3', c1), ('4', out_channels)):
        params['g' + name] = jnp.ones((c, 1), jnp.float32)    # BN weight init
        params['bb' + name] = jnp.zeros((c, 1), jnp.float32)  # BN bias init
    return params


def _reference_forward(x, p):
    """Pure-JAX (XLA conv) reference.  Conv operands are cast to bf16 exactly as
    in the kernel so the check isolates structural correctness; biases are kept
    here to verify they indeed cancel under batch-stats BN."""
    bf = jnp.bfloat16

    def conv3d(x, w, b):
        w5 = jnp.transpose(w, (1, 2, 0))[:, :, :, None, None].astype(bf)
        y = jax.lax.conv_general_dilated(
            x.astype(bf), w5, window_strides=(2, 1, 1),
            padding=((1, 1), (0, 0), (0, 0)),
            dimension_numbers=('NCDHW', 'OIDHW', 'NCDHW'),
            preferred_element_type=jnp.float32)
        return y + b.reshape(1, -1, 1, 1, 1)

    def convT3d(x, w, b):
        w5 = jnp.transpose(jnp.flip(w, axis=0),
                           (1, 2, 0))[:, :, :, None, None].astype(bf)
        y = jax.lax.conv_general_dilated(
            x.astype(bf), w5, window_strides=(1, 1, 1),
            padding=((1, 1), (0, 0), (0, 0)),
            lhs_dilation=(2, 1, 1),
            dimension_numbers=('NCDHW', 'OIDHW', 'NCDHW'),
            preferred_element_type=jnp.float32)
        return y + b.reshape(1, -1, 1, 1, 1)

    def bn(x, g, bb):
        mean = jnp.mean(x, axis=(0, 2, 3, 4), keepdims=True)
        var = jnp.mean(jnp.square(x - mean), axis=(0, 2, 3, 4), keepdims=True)
        return ((x - mean) * jax.lax.rsqrt(var + EPS)
                * g.reshape(1, -1, 1, 1, 1) + bb.reshape(1, -1, 1, 1, 1))

    y = jax.nn.relu(bn(conv3d(x, p['w1'], p['b1']), p['g1'], p['bb1']))
    y = jax.nn.relu(bn(conv3d(y, p['w2'], p['b2']), p['g2'], p['bb2']))
    y = jax.nn.relu(bn(convT3d(y, p['w3'], p['b3']), p['g3'], p['bb3']))
    y = jnp.tanh(bn(convT3d(y, p['w4'], p['b4']), p['g4'], p['bb4']))
    return y


if __name__ == "__main__":
    config = {'in_channels': 4, 'fil_num_g': 4, 'out_channels': 3}
    N, D, H, W = 2, 16, 8, 8

    key = jax.random.PRNGKey(0)
    k_x, k_p = jax.random.split(key)
    x = jax.random.normal(k_x, (N, config['in_channels'], D, H, W), jnp.float32)
    params = init_params(k_p, config['in_channels'], config['fil_num_g'],
                         config['out_channels'])

    out = jax.block_until_ready(g_model_forward(x, params))

    expected_shape = (N, config['out_channels'], 13, H, W)  # D: 16->8->4->7->13
    assert out.shape == expected_shape, (out.shape, expected_shape)

    ref = jax.block_until_ready(_reference_forward(x, params))
    # Both paths use bf16 matmul operands with f32 accumulation, so remaining
    # differences are reduction-order / bias-cancellation rounding only.
    max_err = float(jnp.max(jnp.abs(out - ref)))
    assert max_err < 5e-3, f"mismatch vs reference: {max_err}"

    print("KERNEL_OK")
</pallas_src>

<mosaic_0001>
module attributes {stable_mosaic.version = 11 : i64} {
  func.func @_g_model_kernel(%arg0: memref<12x1024xf32, #tpu.memory_space<vmem>>, %arg1: memref<16x12xbf16, #tpu.memory_space<vmem>>, %arg2: memref<16x1xf32, #tpu.memory_space<vmem>>, %arg3: memref<16x1xf32, #tpu.memory_space<vmem>>, %arg4: memref<32x48xbf16, #tpu.memory_space<vmem>>, %arg5: memref<32x1xf32, #tpu.memory_space<vmem>>, %arg6: memref<32x1xf32, #tpu.memory_space<vmem>>, %arg7: memref<16x32xbf16, #tpu.memory_space<vmem>>, %arg8: memref<16x64xbf16, #tpu.memory_space<vmem>>, %arg9: memref<16x1xf32, #tpu.memory_space<vmem>>, %arg10: memref<16x1xf32, #tpu.memory_space<vmem>>, %arg11: memref<3x16xbf16, #tpu.memory_space<vmem>>, %arg12: memref<3x32xbf16, #tpu.memory_space<vmem>>, %arg13: memref<3x1xf32, #tpu.memory_space<vmem>>, %arg14: memref<3x1xf32, #tpu.memory_space<vmem>>, %arg15: memref<3x1664xf32, #tpu.memory_space<vmem>>) attributes {dimension_semantics = [], scalar_prefetch = 0 : i64, scratch_operands = 0 : i64, tpu.core_type = #tpu.core_type<tc>} {
    %c0 = arith.constant 0 : index
    %c0_0 = arith.constant 0 : index
    %0 = vector.load %arg1[%c0, %c0_0] : memref<16x12xbf16, #tpu.memory_space<vmem>>, vector<16x12xbf16>
    %c0_1 = arith.constant 0 : index
    %c0_2 = arith.constant 0 : index
    %1 = vector.load %arg0[%c0_1, %c0_2] : memref<12x1024xf32, #tpu.memory_space<vmem>>, vector<12x1024xf32>
    %2 = arith.truncf %1 : vector<12x1024xf32> to vector<12x1024xbf16>
    %cst = arith.constant dense<0.000000e+00> : vector<16x1024xf32>
    %3 = tpu.matmul %0, %2, %cst {dimension_numbers = #tpu.dot_dimension_numbers<[1], [0], [0], [1], [0, 0, 1, 1], [], []>} : vector<16x12xbf16>, vector<12x1024xbf16>, vector<16x1024xf32> -> vector<16x1024xf32>
    %cst_3 = arith.constant dense<0.000000e+00> : vector<16xf32>
    %4 = vector.multi_reduction <add>, %3, %cst_3 [1] : vector<16x1024xf32> to vector<16xf32>
    %5 = vector.shape_cast %4 : vector<16xf32> to vector<16x1xf32>
    %6 = arith.mulf %3, %3 : vector<16x1024xf32>
    %cst_4 = arith.constant dense<0.000000e+00> : vector<16xf32>
    %7 = vector.multi_reduction <add>, %6, %cst_4 [1] : vector<16x1024xf32> to vector<16xf32>
    %8 = vector.shape_cast %7 : vector<16xf32> to vector<16x1xf32>
    %cst_5 = arith.constant 9.765625E-4 : f32
    %9 = vector.broadcast %cst_5 : f32 to vector<16x1xf32>
    %10 = arith.mulf %5, %9 : vector<16x1xf32>
    %cst_6 = arith.constant 9.765625E-4 : f32
    %11 = vector.broadcast %cst_6 : f32 to vector<16x1xf32>
    %12 = arith.mulf %8, %11 : vector<16x1xf32>
    %13 = arith.mulf %10, %10 : vector<16x1xf32>
    %14 = arith.subf %12, %13 : vector<16x1xf32>
    %c0_7 = arith.constant 0 : index
    %c0_8 = arith.constant 0 : index
    %15 = vector.load %arg2[%c0_7, %c0_8] : memref<16x1xf32, #tpu.memory_space<vmem>>, vector<16x1xf32>
    %cst_9 = arith.constant 9.99999974E-6 : f32
    %16 = vector.broadcast %cst_9 : f32 to vector<16x1xf32>
    %17 = arith.addf %14, %16 : vector<16x1xf32>
    %18 = math.rsqrt %17 : vector<16x1xf32>
    %19 = arith.mulf %15, %18 : vector<16x1xf32>
    %c0_10 = arith.constant 0 : index
    %c0_11 = arith.constant 0 : index
    %20 = vector.load %arg3[%c0_10, %c0_11] : memref<16x1xf32, #tpu.memory_space<vmem>>, vector<16x1xf32>
    %21 = arith.mulf %10, %19 : vector<16x1xf32>
    %22 = arith.subf %20, %21 : vector<16x1xf32>
    %23 = vector.broadcast %19 : vector<16x1xf32> to vector<16x1024xf32>
    %24 = arith.mulf %3, %23 : vector<16x1024xf32>
    %25 = vector.broadcast %22 : vector<16x1xf32> to vector<16x1024xf32>
    %26 = arith.addf %24, %25 : vector<16x1024xf32>
    %cst_12 = arith.constant 0.000000e+00 : f32
    %27 = vector.broadcast %cst_12 : f32 to vector<16x1024xf32>
    %28 = arith.maximumf %26, %27 : vector<16x1024xf32>
    %29 = arith.truncf %28 : vector<16x1024xf32> to vector<16x1024xbf16>
    %cst_13 = arith.constant 0.000000e+00 : bf16
    %30 = vector.broadcast %cst_13 : bf16 to vector<16x128xbf16>
    %31 = vector.extract_strided_slice %29 {offsets = [0, 128], sizes = [16, 128], strides = [1, 1]} : vector<16x1024xbf16> to vector<16x128xbf16>
    %32 = vector.extract_strided_slice %29 {offsets = [0, 384], sizes = [16, 128], strides = [1, 1]} : vector<16x1024xbf16> to vector<16x128xbf16>
    %33 = vector.extract_strided_slice %29 {offsets = [0, 640], sizes = [16, 128], strides = [1, 1]} : vector<16x1024xbf16> to vector<16x128xbf16>
    %34 = tpu.concatenate %30, %31, %32, %33 in 1 : vector<16x128xbf16>, vector<16x128xbf16>, vector<16x128xbf16>, vector<16x128xbf16> -> vector<16x512xbf16>
    %35 = vector.extract_strided_slice %29 {offsets = [0, 0], sizes = [16, 128], strides = [1, 1]} : vector<16x1024xbf16> to vector<16x128xbf16>
    %36 = vector.extract_strided_slice %29 {offsets = [0, 256], sizes = [16, 128], strides = [1, 1]} : vector<16x1024xbf16> to vector<16x128xbf16>
    %37 = vector.extract_strided_slice %29 {offsets = [0, 512], sizes = [16, 128], strides = [1, 1]} : vector<16x1024xbf16> to vector<16x128xbf16>
    %38 = vector.extract_strided_slice %29 {offsets = [0, 768], sizes = [16, 128], strides = [1, 1]} : vector<16x1024xbf16> to vector<16x128xbf16>
    %39 = tpu.concatenate %35, %36, %37, %38 in 1 : vector<16x128xbf16>, vector<16x128xbf16>, vector<16x128xbf16>, vector<16x128xbf16> -> vector<16x512xbf16>
    %40 = vector.extract_strided_slice %29 {offsets = [0, 128], sizes = [16, 128], strides = [1, 1]} : vector<16x1024xbf16> to vector<16x128xbf16>
    %41 = vector.extract_strided_slice %29 {offsets = [0, 384], sizes = [16, 128], strides = [1, 1]} : vector<16x1024xbf16> to vector<16x128xbf16>
    %42 = vector.extract_strided_slice %29 {offsets = [0, 640], sizes = [16, 128], strides = [1, 1]} : vector<16x1024xbf16> to vector<16x128xbf16>
    %43 = vector.extract_strided_slice %29 {offsets = [0, 896], sizes = [16, 128], strides = [1, 1]} : vector<16x1024xbf16> to vector<16x128xbf16>
    %44 = tpu.concatenate %40, %41, %42, %43 in 1 : vector<16x128xbf16>, vector<16x128xbf16>, vector<16x128xbf16>, vector<16x128xbf16> -> vector<16x512xbf16>
    %45 = tpu.concatenate %34, %39, %44 in 0 : vector<16x512xbf16>, vector<16x512xbf16>, vector<16x512xbf16> -> vector<48x512xbf16>
    %c0_14 = arith.constant 0 : index
    %c0_15 = arith.constant 0 : index
    %46 = vector.load %arg4[%c0_14, %c0_15] : memref<32x48xbf16, #tpu.memory_space<vmem>>, vector<32x48xbf16>
    %cst_16 = arith.constant dense<0.000000e+00> : vector<32x512xf32>
    %47 = tpu.matmul %46, %45, %cst_16 {dimension_numbers = #tpu.dot_dimension_numbers<[1], [0], [0], [1], [0, 0, 1, 1], [], []>} : vector<32x48xbf16>, vector<48x512xbf16>, vector<32x512xf32> -> vector<32x512xf32>
    %cst_17 = arith.constant dense<0.000000e+00> : vector<32xf32>
    %48 = vector.multi_reduction <add>, %47, %cst_17 [1] : vector<32x512xf32> to vector<32xf32>
    %49 = vector.shape_cast %48 : vector<32xf32> to vector<32x1xf32>
    %50 = arith.mulf %47, %47 : vector<32x512xf32>
    %cst_18 = arith.constant dense<0.000000e+00> : vector<32xf32>
    %51 = vector.multi_reduction <add>, %50, %cst_18 [1] : vector<32x512xf32> to vector<32xf32>
    %52 = vector.shape_cast %51 : vector<32xf32> to vector<32x1xf32>
    %cst_19 = arith.constant 0.001953125 : f32
    %53 = vector.broadcast %cst_19 : f32 to vector<32x1xf32>
    %54 = arith.mulf %49, %53 : vector<32x1xf32>
    %cst_20 = arith.constant 0.001953125 : f32
    %55 = vector.broadcast %cst_20 : f32 to vector<32x1xf32>
    %56 = arith.mulf %52, %55 : vector<32x1xf32>
    %57 = arith.mulf %54, %54 : vector<32x1xf32>
    %58 = arith.subf %56, %57 : vector<32x1xf32>
    %c0_21 = arith.constant 0 : index
    %c0_22 = arith.constant 0 : index
    %59 = vector.load %arg5[%c0_21, %c0_22] : memref<32x1xf32, #tpu.memory_space<vmem>>, vector<32x1xf32>
    %cst_23 = arith.constant 9.99999974E-6 : f32
    %60 = vector.broadcast %cst_23 : f32 to vector<32x1xf32>
    %61 = arith.addf %58, %60 : vector<32x1xf32>
    %62 = math.rsqrt %61 : vector<32x1xf32>
    %63 = arith.mulf %59, %62 : vector<32x1xf32>
    %c0_24 = arith.constant 0 : index
    %c0_25 = arith.constant 0 : index
    %64 = vector.load %arg6[%c0_24, %c0_25] : memref<32x1xf32, #tpu.memory_space<vmem>>, vector<32x1xf32>
    %65 = arith.mulf %54, %63 : vector<32x1xf32>
    %66 = arith.subf %64, %65 : vector<32x1xf32>
    %67 = vector.broadcast %63 : vector<32x1xf32> to vector<32x512xf32>
    %68 = arith.mulf %47, %67 : vector<32x512xf32>
    %69 = vector.broadcast %66 : vector<32x1xf32> to vector<32x512xf32>
    %70 = arith.addf %68, %69 : vector<32x512xf32>
    %cst_26 = arith.constant 0.000000e+00 : f32
    %71 = vector.broadcast %cst_26 : f32 to vector<32x512xf32>
    %72 = arith.maximumf %70, %71 : vector<32x512xf32>
    %73 = arith.truncf %72 : vector<32x512xf32> to vector<32x512xbf16>
    %c0_27 = arith.constant 0 : index
    %c0_28 = arith.constant 0 : index
    %74 = vector.load %arg7[%c0_27, %c0_28] : memref<16x32xbf16, #tpu.memory_space<vmem>>, vector<16x32xbf16>
    %cst_29 = arith.constant dense<0.000000e+00> : vector<16x512xf32>
    %75 = tpu.matmul %74, %73, %cst_29 {dimension_numbers = #tpu.dot_dimension_numbers<[1], [0], [0], [1], [0, 0, 1, 1], [], []>} : vector<16x32xbf16>, vector<32x512xbf16>, vector<16x512xf32> -> vector<16x512xf32>
    %76 = vector.extract_strided_slice %73 {offsets = [0, 128], sizes = [32, 384], strides = [1, 1]} : vector<32x512xbf16> to vector<32x384xbf16>
    %77 = vector.extract_strided_slice %73 {offsets = [0, 0], sizes = [32, 384], strides = [1, 1]} : vector<32x512xbf16> to vector<32x384xbf16>
    %78 = tpu.concatenate %76, %77 in 0 : vector<32x384xbf16>, vector<32x384xbf16> -> vector<64x384xbf16>
    %c0_30 = arith.constant 0 : index
    %c0_31 = arith.constant 0 : index
    %79 = vector.load %arg8[%c0_30, %c0_31] : memref<16x64xbf16, #tpu.memory_space<vmem>>, vector<16x64xbf16>
    %cst_32 = arith.constant dense<0.000000e+00> : vector<16x384xf32>
    %80 = tpu.matmul %79, %78, %cst_32 {dimension_numbers = #tpu.dot_dimension_numbers<[1], [0], [0], [1], [0, 0, 1, 1], [], []>} : vector<16x64xbf16>, vector<64x384xbf16>, vector<16x384xf32> -> vector<16x384xf32>
    %81 = vector.extract_strided_slice %75 {offsets = [0, 0], sizes = [16, 128], strides = [1, 1]} : vector<16x512xf32> to vector<16x128xf32>
    %82 = vector.extract_strided_slice %80 {offsets = [0, 0], sizes = [16, 128], strides = [1, 1]} : vector<16x384xf32> to vector<16x128xf32>
    %83 = vector.extract_strided_slice %75 {offsets = [0, 128], sizes = [16, 128], strides = [1, 1]} : vector<16x512xf32> to vector<16x128xf32>
    %84 = vector.extract_strided_slice %80 {offsets = [0, 128], sizes = [16, 128], strides = [1, 1]} : vector<16x384xf32> to vector<16x128xf32>
    %85 = vector.extract_strided_slice %75 {offsets = [0, 256], sizes = [16, 128], strides = [1, 1]} : vector<16x512xf32> to vector<16x128xf32>
    %86 = vector.extract_strided_slice %80 {offsets = [0, 256], sizes = [16, 128], strides = [1, 1]} : vector<16x384xf32> to vector<16x128xf32>
    %87 = vector.extract_strided_slice %75 {offsets = [0, 384], sizes = [16, 128], strides = [1, 1]} : vector<16x512xf32> to vector<16x128xf32>
    %88 = tpu.concatenate %81, %82, %83, %84, %85, %86, %87 in 1 : vector<16x128xf32>, vector<16x128xf32>, vector<16x128xf32>, vector<16x128xf32>, vector<16x128xf32>, vector<16x128xf32>, vector<16x128xf32> -> vector<16x896xf32>
    %cst_33 = arith.constant dense<0.000000e+00> : vector<16xf32>
    %89 = vector.multi_reduction <add>, %88, %cst_33 [1] : vector<16x896xf32> to vector<16xf32>
    %90 = vector.shape_cast %89 : vector<16xf32> to vector<16x1xf32>
    %91 = arith.mulf %88, %88 : vector<16x896xf32>
    %cst_34 = arith.constant dense<0.000000e+00> : vector<16xf32>
    %92 = vector.multi_reduction <add>, %91, %cst_34 [1] : vector<16x896xf32> to vector<16xf32>
    %93 = vector.shape_cast %92 : vector<16xf32> to vector<16x1xf32>
    %cst_35 = arith.constant 0.00111607148 : f32
    %94 = vector.broadcast %cst_35 : f32 to vector<16x1xf32>
    %95 = arith.mulf %90, %94 : vector<16x1xf32>
    %cst_36 = arith.constant 0.00111607148 : f32
    %96 = vector.broadcast %cst_36 : f32 to vector<16x1xf32>
    %97 = arith.mulf %93, %96 : vector<16x1xf32>
    %98 = arith.mulf %95, %95 : vector<16x1xf32>
    %99 = arith.subf %97, %98 : vector<16x1xf32>
    %c0_37 = arith.constant 0 : index
    %c0_38 = arith.constant 0 : index
    %100 = vector.load %arg9[%c0_37, %c0_38] : memref<16x1xf32, #tpu.memory_space<vmem>>, vector<16x1xf32>
    %cst_39 = arith.constant 9.99999974E-6 : f32
    %101 = vector.broadcast %cst_39 : f32 to vector<16x1xf32>
    %102 = arith.addf %99, %101 : vector<16x1xf32>
    %103 = math.rsqrt %102 : vector<16x1xf32>
    %104 = arith.mulf %100, %103 : vector<16x1xf32>
    %c0_40 = arith.constant 0 : index
    %c0_41 = arith.constant 0 : index
    %105 = vector.load %arg10[%c0_40, %c0_41] : memref<16x1xf32, #tpu.memory_space<vmem>>, vector<16x1xf32>
    %106 = arith.mulf %95, %104 : vector<16x1xf32>
    %107 = arith.subf %105, %106 : vector<16x1xf32>
    %108 = vector.broadcast %104 : vector<16x1xf32> to vector<16x896xf32>
    %109 = arith.mulf %88, %108 : vector<16x896xf32>
    %110 = vector.broadcast %107 : vector<16x1xf32> to vector<16x896xf32>
    %111 = arith.addf %109, %110 : vector<16x896xf32>
    %cst_42 = arith.constant 0.000000e+00 : f32
    %112 = vector.broadcast %cst_42 : f32 to vector<16x896xf32>
    %113 = arith.maximumf %111, %112 : vector<16x896xf32>
    %114 = arith.truncf %113 : vector<16x896xf32> to vector<16x896xbf16>
    %c0_43 = arith.constant 0 : index
    %c0_44 = arith.constant 0 : index
    %115 = vector.load %arg11[%c0_43, %c0_44] : memref<3x16xbf16, #tpu.memory_space<vmem>>, vector<3x16xbf16>
    %cst_45 = arith.constant dense<0.000000e+00> : vector<3x896xf32>
    %116 = tpu.matmul %115, %114, %cst_45 {dimension_numbers = #tpu.dot_dimension_numbers<[1], [0], [0], [1], [0, 0, 1, 1], [], []>} : vector<3x16xbf16>, vector<16x896xbf16>, vector<3x896xf32> -> vector<3x896xf32>
    %117 = vector.extract_strided_slice %114 {offsets = [0, 128], sizes = [16, 768], strides = [1, 1]} : vector<16x896xbf16> to vector<16x768xbf16>
    %118 = vector.extract_strided_slice %114 {offsets = [0, 0], sizes = [16, 768], strides = [1, 1]} : vector<16x896xbf16> to vector<16x768xbf16>
    %119 = tpu.concatenate %117, %118 in 0 : vector<16x768xbf16>, vector<16x768xbf16> -> vector<32x768xbf16>
    %c0_46 = arith.constant 0 : index
    %c0_47 = arith.constant 0 : index
    %120 = vector.load %arg12[%c0_46, %c0_47] : memref<3x32xbf16, #tpu.memory_space<vmem>>, vector<3x32xbf16>
    %cst_48 = arith.constant dense<0.000000e+00> : vector<3x768xf32>
    %121 = tpu.matmul %120, %119, %cst_48 {dimension_numbers = #tpu.dot_dimension_numbers<[1], [0], [0], [1], [0, 0, 1, 1], [], []>} : vector<3x32xbf16>, vector<32x768xbf16>, vector<3x768xf32> -> vector<3x768xf32>
    %122 = vector.extract_strided_slice %116 {offsets = [0, 0], sizes = [3, 128], strides = [1, 1]} : vector<3x896xf32> to vector<3x128xf32>
    %123 = vector.extract_strided_slice %121 {offsets = [0, 0], sizes = [3, 128], strides = [1, 1]} : vector<3x768xf32> to vector<3x128xf32>
    %124 = vector.extract_strided_slice %116 {offsets = [0, 128], sizes = [3, 128], strides = [1, 1]} : vector<3x896xf32> to vector<3x128xf32>
    %125 = vector.extract_strided_slice %121 {offsets = [0, 128], sizes = [3, 128], strides = [1, 1]} : vector<3x768xf32> to vector<3x128xf32>
    %126 = vector.extract_strided_slice %116 {offsets = [0, 256], sizes = [3, 128], strides = [1, 1]} : vector<3x896xf32> to vector<3x128xf32>
    %127 = vector.extract_strided_slice %121 {offsets = [0, 256], sizes = [3, 128], strides = [1, 1]} : vector<3x768xf32> to vector<3x128xf32>
    %128 = vector.extract_strided_slice %116 {offsets = [0, 384], sizes = [3, 128], strides = [1, 1]} : vector<3x896xf32> to vector<3x128xf32>
    %129 = vector.extract_strided_slice %121 {offsets = [0, 384], sizes = [3, 128], strides = [1, 1]} : vector<3x768xf32> to vector<3x128xf32>
    %130 = vector.extract_strided_slice %116 {offsets = [0, 512], sizes = [3, 128], strides = [1, 1]} : vector<3x896xf32> to vector<3x128xf32>
    %131 = vector.extract_strided_slice %121 {offsets = [0, 512], sizes = [3, 128], strides = [1, 1]} : vector<3x768xf32> to vector<3x128xf32>
    %132 = vector.extract_strided_slice %116 {offsets = [0, 640], sizes = [3, 128], strides = [1, 1]} : vector<3x896xf32> to vector<3x128xf32>
    %133 = vector.extract_strided_slice %121 {offsets = [0, 640], sizes = [3, 128], strides = [1, 1]} : vector<3x768xf32> to vector<3x128xf32>
    %134 = vector.extract_strided_slice %116 {offsets = [0, 768], sizes = [3, 128], strides = [1, 1]} : vector<3x896xf32> to vector<3x128xf32>
    %135 = tpu.concatenate %122, %123, %124, %125, %126, %127, %128, %129, %130, %131, %132, %133, %134 in 1 : vector<3x128xf32>, vector<3x128xf32>, vector<3x128xf32>, vector<3x128xf32>, vector<3x128xf32>, vector<3x128xf32>, vector<3x128xf32>, vector<3x128xf32>, vector<3x128xf32>, vector<3x128xf32>, vector<3x128xf32>, vector<3x128xf32>, vector<3x128xf32> -> vector<3x1664xf32>
    %cst_49 = arith.constant dense<0.000000e+00> : vector<3xf32>
    %136 = vector.multi_reduction <add>, %135, %cst_49 [1] : vector<3x1664xf32> to vector<3xf32>
    %137 = vector.shape_cast %136 : vector<3xf32> to vector<3x1xf32>
    %138 = arith.mulf %135, %135 : vector<3x1664xf32>
    %cst_50 = arith.constant dense<0.000000e+00> : vector<3xf32>
    %139 = vector.multi_reduction <add>, %138, %cst_50 [1] : vector<3x1664xf32> to vector<3xf32>
    %140 = vector.shape_cast %139 : vector<3xf32> to vector<3x1xf32>
    %cst_51 = arith.constant 6.00961561E-4 : f32
    %141 = vector.broadcast %cst_51 : f32 to vector<3x1xf32>
    %142 = arith.mulf %137, %141 : vector<3x1xf32>
    %cst_52 = arith.constant 6.00961561E-4 : f32
    %143 = vector.broadcast %cst_52 : f32 to vector<3x1xf32>
    %144 = arith.mulf %140, %143 : vector<3x1xf32>
    %145 = arith.mulf %142, %142 : vector<3x1xf32>
    %146 = arith.subf %144, %145 : vector<3x1xf32>
    %c0_53 = arith.constant 0 : index
    %c0_54 = arith.constant 0 : index
    %147 = vector.load %arg13[%c0_53, %c0_54] : memref<3x1xf32, #tpu.memory_space<vmem>>, vector<3x1xf32>
    %cst_55 = arith.constant 9.99999974E-6 : f32
    %148 = vector.broadcast %cst_55 : f32 to vector<3x1xf32>
    %149 = arith.addf %146, %148 : vector<3x1xf32>
    %150 = math.rsqrt %149 : vector<3x1xf32>
    %151 = arith.mulf %147, %150 : vector<3x1xf32>
    %c0_56 = arith.constant 0 : index
    %c0_57 = arith.constant 0 : index
    %152 = vector.load %arg14[%c0_56, %c0_57] : memref<3x1xf32, #tpu.memory_space<vmem>>, vector<3x1xf32>
    %153 = arith.mulf %142, %151 : vector<3x1xf32>
    %154 = arith.subf %152, %153 : vector<3x1xf32>
    %155 = vector.broadcast %151 : vector<3x1xf32> to vector<3x1664xf32>
    %156 = arith.mulf %135, %155 : vector<3x1664xf32>
    %157 = vector.broadcast %154 : vector<3x1xf32> to vector<3x1664xf32>
    %158 = arith.addf %156, %157 : vector<3x1664xf32>
    %159 = math.tanh %158 : vector<3x1664xf32>
    %c0_58 = arith.constant 0 : index
    %c0_59 = arith.constant 0 : index
    %160 = vector.load %arg15[%c0_58, %c0_59] : memref<3x1664xf32, #tpu.memory_space<vmem>>, vector<3x1664xf32>
    tpu.vector_store %arg15[%c0_58, %c0_59], %159 {strides = array<i32>} : memref<3x1664xf32, #tpu.memory_space<vmem>>, vector<3x1664xf32>,
    return
  }
}

</mosaic_0001>

<bundles_post_ra>
// kernel: tpu_custom_call.1
= control target key start
LH: loop header
LB: loop body
LE: loop exit
PB: predicated region body
PF: predicated region fallthrough
CT: control target
= control target key end

     0   :  { %20 = vsyncpa [#allocation3], 0  ;;  %s2258_s0 = inlined_call_operand.hbm [shape: f32[12,1024], index: 0, kind: input, shape index: {}]   ;;  %s2259_s1 = inlined_call_operand.vmem [shape: bf16[16,12], index: 1, kind: input, shape index: {}]   ;;  %s2260_s2 = inlined_call_operand.vmem [shape: f32[16,1], index: 2, kind: input, shape index: {}]   ;;  %s2261_s3 = inlined_call_operand.vmem [shape: f32[16,1], index: 3, kind: input, shape index: {}]   ;;  %s2262_s4 = inlined_call_operand.vmem [shape: bf16[32,48], index: 4, kind: input, shape index: {}]   ;;  %s2263_s5 = inlined_call_operand.vmem [shape: f32[32,1], index: 5, kind: input, shape index: {}]   ;;  %s2264_s6 = inlined_call_operand.vmem [shape: f32[32,1], index: 6, kind: input, shape index: {}]   ;;  %s2265_s7 = inlined_call_operand.vmem [shape: bf16[16,32], index: 7, kind: input, shape index: {}]   ;;  %s2266_s8 = inlined_call_operand.vmem [shape: bf16[16,64], index: 8, kind: input, shape index: {}]   ;;  %s2267_s9 = inlined_call_operand.vmem [shape: f32[16,1], index: 9, kind: input, shape index: {}]   ;;  %s2268_s10 = inlined_call_operand.vmem [shape: f32[16,1], index: 10, kind: input, shape index: {}]   ;;  %s2269_s11 = inlined_call_operand.vmem [shape: bf16[3,16], index: 11, kind: input, shape index: {}]   ;;  %s2270_s12 = inlined_call_operand.vmem [shape: bf16[3,32], index: 12, kind: input, shape index: {}]   ;;  %s2271_s13 = inlined_call_operand.vmem [shape: f32[3,1], index: 13, kind: input, shape index: {}]   ;;  %s2272_s14 = inlined_call_operand.vmem [shape: f32[3,1], index: 14, kind: input, shape index: {}]   ;;  %s2273_s15 = inlined_call_operand.hbm [shape: f32[3,1664], index: 15, kind: output, shape index: {}]  }
   0x1   :  { %21 = vsyncpa [#allocation4], 0  ;;  %s26_s20 = sshll.u32 %s2258_s0, 4  ;;  %s1664_s21 = smov [#allocation2]   ;;  %s27_s20 = int_to_ptr.hbm [resolvable:$true] %s26_s20 }
   0x2   :  { %s28_s22 = sshll.u32 %s1664_s21, 4  ;;  %s1665_s23 = smov 1024   ;;  %s29_s22 = int_to_ptr.vmem [resolvable:$true] %s28_s22 }
   0x3   :  { %s1666_s24 = smov 64  }
   0x4   :  { %34 = dma.hbm_to_vmem [thread:$0]  %s27_s20, 2048, %s29_s22, [#allocation3], %s1665_s23, %s1665_s23, %s1666_s24  }
   0x5   :  { %1660 = dma.done.wait [#allocation3], 2048  }
   0x6   :  { %1661 = vsyncadd [#allocation3], 4294965248  ;;  %v70_v0 = vld [vmem:[#allocation2] sm:$0xff]  ;;  %vm103_vm0 = vcmask 1045504   ;;  %v71_v2 = vld [vmem:[#allocation2 + $0x8] sm:$0xff]  ;;  %vm99_vm1 = vcmask 97280  }
   0x7   :  { %v78_v1 = vld [vmem:[#allocation2 + $0x40] sm:$0xf]  ;;  %v79_v4 = vld [vmem:[#allocation2 + $0x48] sm:$0xf]  ;;  %v72_v5 = vld [vmem:[#allocation2 + $0x10] sm:$0xff]  ;;  %vm462_vm8 = vcmask 392192  }
   0x8   :  { %v86_v3 = vpack.c.bf16 %v78_v1, %v70_v0  ;;  %v80_v6 = vld [vmem:[#allocation2 + $0x50] sm:$0xf]  ;;  %v87_v7 = vpack.c.bf16 %v79_v4, %v71_v2  ;;  %v73_v9 = vld [vmem:[#allocation2 + $0x18] sm:$0xff]  ;;  %v1555_v11 = vld [vmem:[%s2259_s1] sm:$0xff]  ;;  %s1489_s27 = sshll.u32 %s2273_s15, 4  ;;  %s1490_s27 = int_to_ptr.hbm [resolvable:$true] %s1489_s27 }
   0x9   :  { %v88_v8 = vpack.c.bf16 %v80_v6, %v72_v5  ;;  %v81_v10 = vld [vmem:[#allocation2 + $0x58] sm:$0xf]  ;;  %v74_v14 = vld [vmem:[#allocation2 + $0x20] sm:$0xff]  ;;  %v75_v16 = vld [vmem:[#allocation2 + $0x28] sm:$0xff] }
   0xa   :  { %v105_v12 = vsel %vm103_vm0, %v86_v3, 0  ;;  %v89_v13 = vpack.c.bf16 %v81_v10, %v73_v9  ;;  %v82_v15 = vld [vmem:[#allocation2 + $0x60] sm:$0xf]  ;;  %v108_v17 = vsel %vm103_vm0, %v87_v7, 0  ;;  %v83_v20 = vld [vmem:[#allocation2 + $0x68] sm:$0xf] }
   0xb   :  { %135 = vmatpush.bf16.msra.mxu0 %v105_v12  ;;  %v111_v18 = vsel %vm103_vm0, %v88_v8, 0  ;;  %v90_v19 = vpack.c.bf16 %v82_v15, %v74_v14  ;;  %v76_v21 = vld [vmem:[#allocation2 + $0x30] sm:$0xff]  ;;  %v77_v22 = vld [vmem:[#allocation2 + $0x38] sm:$0xff]  ;;  %149 = vmatpush.bf16.msra.mxu1 %v108_v17  ;;  %v91_v24 = vpack.c.bf16 %v83_v20, %v75_v16 }
   0xc   :  { %163 = vmatpush.bf16.msra.mxu2 %v111_v18  ;;  %v114_v23 = vsel %vm103_vm0, %v89_v13, 0  ;;  %v84_v25 = vld [vmem:[#allocation2 + $0x70] sm:$0xf]  ;;  %v85_v26 = vld [vmem:[#allocation2 + $0x78] sm:$0xf] }
   0xd   :  { %177 = vmatpush.bf16.msra.mxu3 %v114_v23  ;;  %v117_v27 = vsel %vm103_vm0, %v90_v19, 0  ;;  %v92_v28 = vpack.c.bf16 %v84_v25, %v76_v21  ;;  %v93_v29 = vpack.c.bf16 %v85_v26, %v77_v22  ;;  %v120_v30 = vsel %vm103_vm0, %v91_v24, 0 }
   0xe   :  { %1503 = vmatmul.msk.bf16.vlgmr.msra.gmra.mxu0 %vm99_vm1, %v1555_v11  ;;  %1504 = vmatmul.msk.bf16.vlgmr.msra.gmra.mxu1 %vm99_vm1, %v1555_v11 }
   0xf   :  { %1505 = vmatmul.msk.bf16.vlgmr.msra.gmra.mxu2 %vm99_vm1, %v1555_v11  ;;  %v123_v31 = vsel %vm103_vm0, %v92_v28, 0  ;;  %v126_v32 = vsel %vm103_vm0, %v93_v29, 0  ;;  %191 = vmatpush.bf16.msrb.mxu0 %v117_v27  ;;  %v1667_v29 = vmov 0  }
  0x10   :  { %1506 = vmatmul.msk.bf16.vlgmr.msra.gmra.mxu3 %vm99_vm1, %v1555_v11  ;;  %205 = vmatpush.bf16.msrb.mxu1 %v120_v30 }
  0x11   :  { %219 = vmatpush.bf16.msrb.mxu2 %v123_v31  ;;  %233 = vmatpush.bf16.msrb.mxu3 %v126_v32 }
  0x12   :  { %1565 = vset.pattern.permute.xlu2 %v1667_v29  ;;  %1566 = vset.pattern.permute.xlu0 %v1667_v29 }
  0x13   :  { %1567 = vset.pattern.permute.xlu1 %v1667_v29 }
  0x1e   :  { %1507 = vmatmul.msk.bf16.vlgmr.msrb.gmra.mxu0 %vm99_vm1, %v1555_v11  ;;  %1508 = vmatmul.msk.bf16.vlgmr.msrb.gmra.mxu1 %vm99_vm1, %v1555_v11 }
  0x1f   :  { %1509 = vmatmul.msk.bf16.vlgmr.msrb.gmra.mxu2 %vm99_vm1, %v1555_v11 }
  0x20   :  { %1510 = vmatmul.msk.bf16.vlgmr.msrb.gmra.mxu3 %vm99_vm1, %v1555_v11 }
  0x8b   :  { %v1771_v33 = vpop.f32.mrf.mxu0  ;;  %v1773_v34 = vpop.f32.mrf.mxu1 }
  0x8c   :  { %v258_v36 = vmul.f32 %v1771_v33, %v1771_v33  ;;  %v259_v37 = vmul.f32 %v1773_v34, %v1773_v34  ;;  %v240_v41 = vadd.f32 %v1773_v34, %v1771_v33 }
  0x8e   :  { %v274_v43 = vadd.f32 %v259_v37, %v258_v36 }
  0x92   :  { %v1775_v35 = vpop.f32.mrf.mxu2 }
  0x93   :  { %v1781_v38 = vpop.f32.mrf.mxu3  ;;  %v1783_v39 = vpop.f32.mrf.mxu0  ;;  %v260_v42 = vmul.f32 %v1775_v35, %v1775_v35  ;;  %v241_v44 = vadd.f32 %v240_v41, %v1775_v35 }
  0x94   :  { %v1785_v40 = vpop.f32.mrf.mxu1  ;;  %v261_v46 = vmul.f32 %v1781_v38, %v1781_v38  ;;  %v266_v49 = vmul.f32 %v1783_v39, %v1783_v39 }
  0x95   :  { %v275_v45 = vadd.f32 %v274_v43, %v260_v42  ;;  %v242_v48 = vadd.f32 %v241_v44, %v1781_v38  ;;  %v267_v50 = vmul.f32 %v1785_v40, %v1785_v40  ;;  %v249_v56 = vadd.f32 %v1785_v40, %v1783_v39 }
  0x97   :  { %v276_v55 = vadd.f32 %v275_v45, %v261_v46  ;;  %v283_v59 = vadd.f32 %v267_v50, %v266_v49 }
  0x9a   :  { %v1794_v47 = vpop.f32.mrf.mxu2 }
  0x9b   :  { %v1801_v51 = vpop.f32.mrf.mxu3  ;;  %v1803_v52 = vpop.f32.mrf.mxu0  ;;  %v268_v57 = vmul.f32 %v1794_v47, %v1794_v47  ;;  %v250_v60 = vadd.f32 %v249_v56, %v1794_v47 }
  0x9c   :  { %v262_v53 = vmul.f32 %v1803_v52, %v1803_v52  ;;  %v1807_v54 = vpop.f32.mrf.mxu1  ;;  %v243_v58 = vadd.f32 %v242_v48, %v1803_v52  ;;  %v269_v1 = vmul.f32 %v1801_v51, %v1801_v51 }
  0x9d   :  { %v263_v62 = vmul.f32 %v1807_v54, %v1807_v54  ;;  %v284_v63 = vadd.f32 %v283_v59, %v268_v57  ;;  %v251_v3 = vadd.f32 %v250_v60, %v1801_v51 }
  0x9e   :  { %v277_v61 = vadd.f32 %v276_v55, %v262_v53  ;;  %v244_v0 = vadd.f32 %v243_v58, %v1807_v54 }
  0x9f   :  { %v285_v11 = vadd.f32 %v284_v63, %v269_v1 }
  0xa0   :  { %v278_v8 = vadd.f32 %v277_v61, %v263_v62  ;;  %v300_v61 = vld [vmem:[%s2260_s2] sm:$0xff] }
  0xa2   :  { %v1820_v2 = vpop.f32.mrf.mxu2 }
  0xa3   :  { %v264_v4 = vmul.f32 %v1820_v2, %v1820_v2  ;;  %v1825_v5 = vpop.f32.mrf.mxu3  ;;  %v1827_v6 = vpop.f32.mrf.mxu0  ;;  %v245_v7 = vadd.f32 %v244_v0, %v1820_v2 }
  0xa4   :  { %v270_v9 = vmul.f32 %v1827_v6, %v1827_v6  ;;  %v265_v10 = vmul.f32 %v1825_v5, %v1825_v5  ;;  %v252_v12 = vadd.f32 %v251_v3, %v1827_v6  ;;  %v1836_v15 = vpop.f32.mrf.mxu1 }
  0xa5   :  { %v246_v13 = vadd.f32 %v245_v7, %v1825_v5  ;;  %v279_v14 = vadd.f32 %v278_v8, %v264_v4  ;;  %v271_v19 = vmul.f32 %v1836_v15, %v1836_v15  ;;  %v326_v4 = vld [vmem:[%s2261_s3] sm:$0xff] }
  0xa6   :  { %v286_v16 = vadd.f32 %v285_v11, %v270_v9  ;;  %v253_v18 = vadd.f32 %v252_v12, %v1836_v15 }
  0xa7   :  { %247 = vadd.xlane.f32.xlu0 %v246_v13  ;;  %v280_v17 = vadd.f32 %v279_v14, %v265_v10  ;;  %v301_v10 = vld [vmem:[%s2260_s2 + $0x8] sm:$0xff] }
  0xa8   :  { %v287_v24 = vadd.f32 %v286_v16, %v271_v19  ;;  %v327_v14 = vld [vmem:[%s2261_s3 + $0x8] sm:$0xff] }
  0xa9   :  { %281 = vadd.xlane.f32.xlu1 %v280_v17 }
  0xaa   :  { %v1841_v20 = vpop.f32.mrf.mxu2 }
  0xab   :  { %v272_v21 = vmul.f32 %v1841_v20, %v1841_v20  ;;  %v1845_v22 = vpop.f32.mrf.mxu3  ;;  %v254_v23 = vadd.f32 %v253_v18, %v1841_v20 }
  0xac   :  { %v273_v26 = vmul.f32 %v1845_v22, %v1845_v22 }
  0xad   :  { %v255_v25 = vadd.f32 %v254_v23, %v1845_v22  ;;  %v288_v27 = vadd.f32 %v287_v24, %v272_v21 }
  0xaf   :  { %256 = vadd.xlane.f32.xlu0 %v255_v25  ;;  %v289_v28 = vadd.f32 %v288_v27, %v273_v26 }
  0xb1   :  { %290 = vadd.xlane.f32.xlu1 %v289_v28 }
 0x11a   :  { %v248_v30 = vpop.xlane.xlu0 %247 }
 0x11b   :  { %v292_v31 = vmul.f32 0.0009765625, %v248_v30 }
 0x11c   :  { %v282_v32 = vpop.xlane.xlu1 %281 }
 0x11d   :  { %v296_v36 = vmul.f32 %v292_v31, %v292_v31  ;;  %v294_v37 = vmul.f32 0.0009765625, %v282_v32 }
 0x11f   :  { %v298_v41 = vsub.f32 %v294_v37, %v296_v36 }
 0x121   :  { %v302_v42 = vadd.f32 1e-05, %v298_v41 }
 0x122   :  { %v257_v43 = vpop.xlane.xlu0 %256 }
 0x123   :  { %1568 = vrsqrt.f32 %v302_v42  ;;  %v293_v44 = vmul.f32 0.0009765625, %v257_v43  ;;  %vm310_vm3 = vweird.f32 %v302_v42 }
 0x124   :  { %v291_v45 = vpop.xlane.xlu1 %290 }
 0x125   :  { %v297_v46 = vmul.f32 %v293_v44, %v293_v44  ;;  %v295_v48 = vmul.f32 0.0009765625, %v291_v45 }
 0x127   :  { %v299_v49 = vsub.f32 %v295_v48, %v297_v46 }
 0x129   :  { %v1569_v50 = vpop.eup %1568  ;;  %v303_v53 = vadd.f32 1e-05, %v299_v49 }
 0x12a   :  { %v305_v55 = vmul.f32 %v1569_v50, %v302_v42  ;;  %vm311_vm2 = vweird.f32 %v1569_v50 }
 0x12b   :  { %1570 = vrsqrt.f32 %v303_v53  ;;  %vm312_vm4 = vmor %vm310_vm3, %vm311_vm2  ;;  %vm320_vm6 = vweird.f32 %v303_v53 }
 0x12c   :  { %v306_v56 = vmul.f32 %v1569_v50, %v305_v55 }
 0x12e   :  { %v307_v57 = vmul.f32 0.5, %v306_v56 }
 0x130   :  { %v308_v58 = vsub.f32 1.5, %v307_v57 }
 0x131   :  { %v1571_v59 = vpop.eup %1570 }
 0x132   :  { %v315_v60 = vmul.f32 %v1571_v59, %v303_v53  ;;  %v309_v62 = vmul.f32 %v1569_v50, %v308_v58  ;;  %vm321_vm5 = vweird.f32 %v1571_v59 }
 0x133   :  { %vm322_vm7 = vmor %vm320_vm6, %vm321_vm5  ;;  %vm824_vm5 = vcmask 261120   ;;  %vm891_vm6 = vcmask 523264  }
 0x134   :  { %v316_v63 = vmul.f32 %v1571_v59, %v315_v60  ;;  %v313_v0 = vsel %vm312_vm4, %v1569_v50, %v309_v62 }
 0x135   :  { %v324_v1 = vmul.f32 %v313_v0, %v300_v61 }
 0x136   :  { %v317_v3 = vmul.f32 0.5, %v316_v63 }
 0x137   :  { %334 = vperm.xlu2 %1565, %v324_v1   ;;  %v328_v7 = vmul.f32 %v324_v1, %v292_v31 }
 0x138   :  { %v318_v8 = vsub.f32 1.5, %v317_v3 }
 0x139   :  { %v330_v9 = vsub.f32 %v326_v4, %v328_v7 }
 0x13a   :  { %v319_v11 = vmul.f32 %v1571_v59, %v318_v8 }
 0x13b   :  { %360 = vperm.xlu0 %1566, %v330_v9  }
 0x13c   :  { %v323_v12 = vsel %vm322_vm7, %v1571_v59, %v319_v11 }
 0x13d   :  { %v325_v13 = vmul.f32 %v323_v12, %v301_v10 }
 0x13f   :  { %339 = vperm.xlu2 %1565, %v325_v13   ;;  %v329_v16 = vmul.f32 %v325_v13, %v293_v44 }
 0x141   :  { %v331_v17 = vsub.f32 %v327_v14, %v329_v16 }
 0x143   :  { %365 = vperm.xlu1 %1567, %v331_v17  }
 0x191   :  { %v335_v18 = vpop.permute.xlu2 %334 }
 0x192   :  { %v342_v19 = vmul.f32 %v335_v18, %v1771_v33  ;;  %v343_v21 = vmul.f32 %v335_v18, %v1773_v34  ;;  %v344_v23 = vmul.f32 %v335_v18, %v1775_v35  ;;  %v345_v24 = vmul.f32 %v335_v18, %v1781_v38 }
 0x193   :  { %v346_v26 = vmul.f32 %v335_v18, %v1803_v52  ;;  %v347_v27 = vmul.f32 %v335_v18, %v1807_v54  ;;  %v348_v28 = vmul.f32 %v335_v18, %v1820_v2  ;;  %v349_v30 = vmul.f32 %v335_v18, %v1825_v5 }
 0x199   :  { %v340_v35 = vpop.permute.xlu2 %339 }
 0x19a   :  { %v350_v2 = vmul.f32 %v340_v35, %v1783_v39  ;;  %v351_v5 = vmul.f32 %v340_v35, %v1785_v40  ;;  %v352_v49 = vmul.f32 %v340_v35, %v1794_v47  ;;  %v353_v50 = vmul.f32 %v340_v35, %v1801_v51 }
 0x19b   :  { %v354_v53 = vmul.f32 %v340_v35, %v1827_v6  ;;  %v355_v55 = vmul.f32 %v340_v35, %v1836_v15  ;;  %v356_v56 = vmul.f32 %v340_v35, %v1841_v20  ;;  %v357_v57 = vmul.f32 %v340_v35, %v1845_v22 }
 0x1ad   :  { %v361_v25 = vpop.permute.xlu0 %360 }
 0x1ae   :  { %v368_v31 = vadd.f32 %v361_v25, %v342_v19  ;;  %v369_v32 = vadd.f32 %v361_v25, %v343_v21  ;;  %v370_v36 = vadd.f32 %v361_v25, %v344_v23  ;;  %v371_v37 = vadd.f32 %v361_v25, %v345_v24 }
 0x1af   :  { %v372_v33 = vadd.f32 %v361_v25, %v346_v26  ;;  %v373_v41 = vadd.f32 %v361_v25, %v347_v27  ;;  %v374_v34 = vadd.f32 %v361_v25, %v348_v28  ;;  %v375_v42 = vadd.f32 %v361_v25, %v349_v30 }
 0x1b0   :  { %v384_v43 = vmax.f32 %v368_v31, 0.0  ;;  %v385_v38 = vmax.f32 %v369_v32, 0.0  ;;  %v386_v44 = vmax.f32 %v370_v36, 0.0  ;;  %v387_v45 = vmax.f32 %v371_v37, 0.0 }
 0x1b1   :  { %v388_v52 = vmax.f32 %v372_v33, 0.0  ;;  %v389_v46 = vmax.f32 %v373_v41, 0.0  ;;  %v390_v54 = vmax.f32 %v374_v34, 0.0  ;;  %v391_v48 = vmax.f32 %v375_v42, 0.0 }
 0x1b2   :  { %v400_v59 = vpack.c.bf16 %v385_v38, %v384_v43  ;;  %v401_v60 = vpack.c.bf16 %v387_v45, %v386_v44  ;;  %v1556_v44 = vld [vmem:[%s2262_s4] sm:$0xff]  ;;  %v1557_v45 = vld [vmem:[%s2262_s4 + $0x8] sm:$0xff] }
 0x1b3   :  { %v402_v61 = vpack.c.bf16 %v389_v46, %v388_v52  ;;  %v403_v62 = vpack.c.bf16 %v391_v48, %v390_v54 }
 0x1b4   :  { %v410_v14 = vunpack.c.h.b16 %v400_v59  ;;  %v416_v17 = vunpack.c.h.b16 %v401_v60  ;;  %v426_v37 = vunpack.c.l.b16 %v400_v59  ;;  %v430_v33 = vunpack.c.l.b16 %v401_v60 }
 0x1b5   :  { %v366_v58 = vpop.permute.xlu1 %365  ;;  %v422_v19 = vunpack.c.h.b16 %v402_v61  ;;  %v444_v23 = vunpack.c.h.b16 %v403_v62  ;;  %v434_v41 = vunpack.c.l.b16 %v402_v61  ;;  %v440_v34 = vunpack.c.l.b16 %v403_v62 }
 0x1b6   :  { %v376_v39 = vadd.f32 %v366_v58, %v350_v2  ;;  %v377_v63 = vadd.f32 %v366_v58, %v351_v5  ;;  %v378_v40 = vadd.f32 %v366_v58, %v352_v49  ;;  %v379_v0 = vadd.f32 %v366_v58, %v353_v50 }
 0x1b7   :  { %v380_v47 = vadd.f32 %v366_v58, %v354_v53  ;;  %v381_v1 = vadd.f32 %v366_v58, %v355_v55  ;;  %v382_v51 = vadd.f32 %v366_v58, %v356_v56  ;;  %v383_v3 = vadd.f32 %v366_v58, %v357_v57 }
 0x1b8   :  { %v392_v6 = vmax.f32 %v376_v39, 0.0  ;;  %v393_v4 = vmax.f32 %v377_v63, 0.0  ;;  %v394_v15 = vmax.f32 %v378_v40, 0.0  ;;  %v395_v7 = vmax.f32 %v379_v0, 0.0 }
 0x1b9   :  { %v396_v20 = vmax.f32 %v380_v47, 0.0  ;;  %v397_v8 = vmax.f32 %v381_v1, 0.0  ;;  %v398_v22 = vmax.f32 %v382_v51, 0.0  ;;  %v399_v9 = vmax.f32 %v383_v3, 0.0 }
 0x1ba   :  { %v404_v10 = vpack.c.bf16 %v393_v4, %v392_v6  ;;  %v405_v11 = vpack.c.bf16 %v395_v7, %v394_v15 }
 0x1bb   :  { %v406_v12 = vpack.c.bf16 %v397_v8, %v396_v20  ;;  %v407_v13 = vpack.c.bf16 %v399_v9, %v398_v22 }
 0x1bc   :  { %v411_v16 = vunpack.c.h.b16 %v404_v10  ;;  %v417_v18 = vunpack.c.h.b16 %v405_v11  ;;  %v427_v27 = vunpack.c.l.b16 %v404_v10  ;;  %v431_v28 = vunpack.c.l.b16 %v405_v11 }
 0x1bd   :  { %v423_v21 = vunpack.c.h.b16 %v406_v12  ;;  %v445_v24 = vunpack.c.h.b16 %v407_v13  ;;  %v435_v32 = vunpack.c.l.b16 %v406_v12  ;;  %v441_v36 = vunpack.c.l.b16 %v407_v13 }
 0x1be   :  { %v412_v25 = vpack.c.b16 %v411_v16, %v410_v14  ;;  %v418_v26 = vpack.c.b16 %v417_v18, %v416_v17  ;;  %v428_v42 = vpack.c.b16 %v427_v27, %v426_v37  ;;  %v432_v35 = vpack.c.b16 %v431_v28, %v430_v33 }
 0x1bf   :  { %v424_v30 = vpack.c.b16 %v423_v21, %v422_v19  ;;  %v446_v31 = vpack.c.b16 %v445_v24, %v444_v23  ;;  %v436_v43 = vpack.c.b16 %v435_v32, %v434_v41  ;;  %v442_v38 = vpack.c.b16 %v441_v36, %v440_v34 }
 0x1c0   :  { %474 = vmatpush.bf16.msra.mxu0 %v412_v25  ;;  %493 = vmatpush.bf16.msra.mxu1 %v418_v26 }
 0x1c1   :  { %512 = vmatpush.bf16.msra.mxu2 %v424_v30  ;;  %531 = vmatpush.bf16.msra.mxu3 %v446_v31 }
 0x1c4   :  { %475 = vmatpush.bf16.msra.mxu0 %v428_v42  ;;  %494 = vmatpush.bf16.msra.mxu1 %v432_v35 }
 0x1c5   :  { %513 = vmatpush.bf16.msra.mxu2 %v436_v43  ;;  %532 = vmatpush.bf16.msra.mxu3 %v442_v38 }
 0x1c8   :  { %476 = vmatpush.bf16.msra.mxu0 %v1667_v29  ;;  %495 = vmatpush.bf16.msra.mxu1 %v412_v25 }
 0x1c9   :  { %514 = vmatpush.bf16.msra.mxu2 %v418_v26  ;;  %533 = vmatpush.bf16.msra.mxu3 %v424_v30 }
 0x1cb   :  { %1519 = vmatmul.msk.bf16.vlgmr.msra.gmra.mxu0 %vm462_vm8, %v1556_v44  ;;  %1521 = vmatmul.msk.bf16.vlgmr.msra.gmra.mxu1 %vm462_vm8, %v1556_v44 }
 0x1cc   :  { %1523 = vmatmul.msk.bf16.vlgmr.msra.gmra.mxu2 %vm462_vm8, %v1556_v44  ;;  %1525 = vmatmul.msk.bf16.vlgmr.msra.gmra.mxu3 %vm462_vm8, %v1556_v44 }
 0x1db   :  { %1520 = vmatmul.msk.bf16.gmra.mxu0 %vm462_vm8, %v1557_v45  ;;  %1522 = vmatmul.msk.bf16.gmra.mxu1 %vm462_vm8, %v1557_v45 }
 0x1dc   :  { %1524 = vmatmul.msk.bf16.gmra.mxu2 %vm462_vm8, %v1557_v45  ;;  %1526 = vmatmul.msk.bf16.gmra.mxu3 %vm462_vm8, %v1557_v45 }
 0x248   :  { %v1889_v52 = vpop.f32.mrf.mxu0  ;;  %v1891_v46 = vpop.f32.mrf.mxu1 }
 0x249   :  { %v545_v63 = vadd.f32 %v1891_v46, %v1889_v52  ;;  %v565_v25 = vmul.f32 %v1889_v52, %v1889_v52  ;;  %v566_v26 = vmul.f32 %v1891_v46, %v1891_v46 }
 0x24b   :  { %v581_v32 = vadd.f32 %v566_v26, %v565_v25 }
 0x24f   :  { %v1893_v29 = vpop.f32.mrf.mxu2  ;;  %v1895_v54 = vpop.f32.mrf.mxu3 }
 0x250   :  { %v1897_v48 = vpop.f32.mrf.mxu0  ;;  %v1899_v2 = vpop.f32.mrf.mxu1  ;;  %v546_v6 = vadd.f32 %v545_v63, %v1893_v29  ;;  %v567_v30 = vmul.f32 %v1893_v29, %v1893_v29  ;;  %v568_v36 = vmul.f32 %v1895_v54, %v1895_v54 }
 0x251   :  { %v569_v15 = vmul.f32 %v1897_v48, %v1897_v48  ;;  %v570_v7 = vmul.f32 %v1899_v2, %v1899_v2  ;;  %v550_v11 = vadd.f32 %v1899_v2, %v1897_v48 }
 0x252   :  { %v547_v9 = vadd.f32 %v546_v6, %v1895_v54  ;;  %v582_v37 = vadd.f32 %v581_v32, %v567_v30 }
 0x253   :  { %v586_v12 = vadd.f32 %v570_v7, %v569_v15 }
 0x254   :  { %v583_v33 = vadd.f32 %v582_v37, %v568_v36 }
 0x257   :  { %v1901_v5 = vpop.f32.mrf.mxu2  ;;  %v1903_v49 = vpop.f32.mrf.mxu3 }
 0x258   :  { %v1905_v50 = vpop.f32.mrf.mxu0  ;;  %v1907_v53 = vpop.f32.mrf.mxu1  ;;  %v571_v22 = vmul.f32 %v1901_v5, %v1901_v5  ;;  %v551_v13 = vadd.f32 %v550_v11, %v1901_v5  ;;  %v572_v18 = vmul.f32 %v1903_v49, %v1903_v49 }
 0x259   :  { %v573_v55 = vmul.f32 %v1905_v50, %v1905_v50  ;;  %v574_v56 = vmul.f32 %v1907_v53, %v1907_v53  ;;  %v555_v57 = vadd.f32 %v1907_v53, %v1905_v50 }
 0x25a   :  { %v587_v14 = vadd.f32 %v586_v12, %v571_v22  ;;  %v552_v21 = vadd.f32 %v551_v13, %v1903_v49 }
 0x25b   :  { %v591_v58 = vadd.f32 %v574_v56, %v573_v55 }
 0x25c   :  { %v588_v23 = vadd.f32 %v587_v14, %v572_v18  ;;  %v671_v14 = vld [vmem:[%s2264_s6 + $0x10] sm:$0xff] }
 0x25f   :  { %v1915_v59 = vpop.f32.mrf.mxu2  ;;  %v1917_v60 = vpop.f32.mrf.mxu3 }
 0x260   :  { %v575_v61 = vmul.f32 %v1915_v59, %v1915_v59  ;;  %v556_v62 = vadd.f32 %v555_v57, %v1915_v59  ;;  %v576_v39 = vmul.f32 %v1917_v60, %v1917_v60  ;;  %v1927_v47 = vpop.f32.mrf.mxu0  ;;  %v1929_v1 = vpop.f32.mrf.mxu1 }
 0x261   :  { %v560_v3 = vadd.f32 %v1929_v1, %v1927_v47  ;;  %v577_v16 = vmul.f32 %v1927_v47, %v1927_v47  ;;  %v578_v17 = vmul.f32 %v1929_v1, %v1929_v1 }
 0x262   :  { %v557_v40 = vadd.f32 %v556_v62, %v1917_v60  ;;  %v592_v0 = vadd.f32 %v591_v58, %v575_v61 }
 0x263   :  { %v596_v24 = vadd.f32 %v578_v17, %v577_v16 }
 0x264   :  { %558 = vadd.xlane.f32.xlu2 %v557_v40  ;;  %v593_v51 = vadd.f32 %v592_v0, %v576_v39 }
 0x266   :  { %594 = vadd.xlane.f32.xlu0 %v593_v51 }
 0x267   :  { %v1934_v4 = vpop.f32.mrf.mxu2  ;;  %v1941_v8 = vpop.f32.mrf.mxu3 }
 0x268   :  { %v561_v20 = vadd.f32 %v560_v3, %v1934_v4  ;;  %v579_v19 = vmul.f32 %v1934_v4, %v1934_v4  ;;  %v580_v28 = vmul.f32 %v1941_v8, %v1941_v8 }
 0x26a   :  { %v562_v10 = vadd.f32 %v561_v20, %v1941_v8  ;;  %v597_v27 = vadd.f32 %v596_v24, %v579_v19  ;;  %v619_v20 = vld [vmem:[%s2263_s5 + $0x10] sm:$0xff] }
 0x26c   :  { %548 = vadd.xlane.f32.xlu2 %v547_v9  ;;  %563 = vadd.xlane.f32.xlu1 %v562_v10  ;;  %v598_v31 = vadd.f32 %v597_v27, %v580_v28 }
 0x274   :  { %553 = vadd.xlane.f32.xlu2 %v552_v21  ;;  %589 = vadd.xlane.f32.xlu1 %v588_v23 }
 0x27c   :  { %599 = vadd.xlane.f32.xlu2 %v598_v31 }
 0x284   :  { %584 = vadd.xlane.f32.xlu2 %v583_v33 }
 0x2d7   :  { %v559_v41 = vpop.xlane.xlu2 %558 }
 0x2d8   :  { %v603_v34 = vmul.f32 0.001953125, %v559_v41  ;;  %v618_v41 = vld [vmem:[%s2263_s5 + $0x8] sm:$0xff] }
 0x2d9   :  { %v595_v42 = vpop.xlane.xlu0 %594 }
 0x2da   :  { %v611_v35 = vmul.f32 %v603_v34, %v603_v34  ;;  %v607_v43 = vmul.f32 0.001953125, %v595_v42 }
 0x2dc   :  { %v615_v38 = vsub.f32 %v607_v43, %v611_v35 }
 0x2de   :  { %v623_v44 = vadd.f32 1e-05, %v615_v38 }
 0x2df   :  { %v549_v45 = vpop.xlane.xlu2 %548  ;;  %v564_v55 = vpop.xlane.xlu1 %563 }
 0x2e0   :  { %1572 = vrsqrt.f32 %v623_v44  ;;  %v604_v51 = vmul.f32 0.001953125, %v564_v55  ;;  %vm651_vm10 = vweird.f32 %v623_v44  ;;  %v601_v16 = vmul.f32 0.001953125, %v549_v45 }
 0x2e2   :  { %v612_v9 = vmul.f32 %v604_v51, %v604_v51  ;;  %v609_v25 = vmul.f32 %v601_v16, %v601_v16 }
 0x2e6   :  { %v1573_v56 = vpop.eup %1572 }
 0x2e7   :  { %v646_v57 = vmul.f32 %v1573_v56, %v623_v44  ;;  %v554_v58 = vpop.xlane.xlu2 %553  ;;  %v590_v61 = vpop.xlane.xlu1 %589  ;;  %vm652_vm9 = vweird.f32 %v1573_v56 }
 0x2e8   :  { %v1969_v62 = vmul.f32 0.001953125, %v554_v58  ;;  %v606_v40 = vmul.f32 0.001953125, %v590_v61  ;;  %vm653_vm11 = vmor %vm651_vm10, %vm652_vm9 }
 0x2e9   :  { %v647_v39 = vmul.f32 %v1573_v56, %v646_v57 }
 0x2ea   :  { %v610_v63 = vmul.f32 %v1969_v62, %v1969_v62 }
 0x2eb   :  { %v648_v0 = vmul.f32 0.5, %v647_v39 }
 0x2ec   :  { %v614_v3 = vsub.f32 %v606_v40, %v610_v63  ;;  %v672_v63 = vld [vmem:[%s2264_s6 + $0x18] sm:$0xff] }
 0x2ed   :  { %v649_v6 = vsub.f32 1.5, %v648_v0 }
 0x2ee   :  { %v622_v15 = vadd.f32 1e-05, %v614_v3 }
 0x2ef   :  { %v600_v7 = vpop.xlane.xlu2 %599  ;;  %v650_v22 = vmul.f32 %v1573_v56, %v649_v6  ;;  %v617_v6 = vld [vmem:[%s2263_s5] sm:$0xff] }
 0x2f0   :  { %1574 = vrsqrt.f32 %v622_v15  ;;  %v608_v10 = vmul.f32 0.001953125, %v600_v7  ;;  %vm641_vm13 = vweird.f32 %v622_v15 }
 0x2f1   :  { %v654_v11 = vsel %vm653_vm11, %v1573_v56, %v650_v22  ;;  %v620_v56 = vld [vmem:[%s2263_s5 + $0x18] sm:$0xff]  ;;  %v669_v22 = vld [vmem:[%s2264_s6] sm:$0xff] }
 0x2f2   :  { %v616_v12 = vsub.f32 %v608_v10, %v612_v9  ;;  %v667_v13 = vmul.f32 %v654_v11, %v619_v20  ;;  %v670_v11 = vld [vmem:[%s2264_s6 + $0x8] sm:$0xff] }
 0x2f4   :  { %v624_v17 = vadd.f32 1e-05, %v616_v12  ;;  %693 = vperm.xlu2 %1565, %v667_v13   ;;  %v675_v18 = vmul.f32 %v667_v13, %v603_v34 }
 0x2f6   :  { %v1575_v19 = vpop.eup %1574  ;;  %1576 = vrsqrt.f32 %v624_v17  ;;  %v679_v21 = vsub.f32 %v671_v14, %v675_v18  ;;  %vm661_vm0 = vweird.f32 %v624_v17 }
 0x2f7   :  { %v636_v23 = vmul.f32 %v1575_v19, %v622_v15  ;;  %v585_v24 = vpop.xlane.xlu2 %584  ;;  %vm642_vm12 = vweird.f32 %v1575_v19 }
 0x2f8   :  { %v605_v26 = vmul.f32 0.001953125, %v585_v24  ;;  %729 = vperm.xlu0 %1566, %v679_v21   ;;  %vm643_vm14 = vmor %vm641_vm13, %vm642_vm12  ;;  %vm1130_vm13 = vcmask 130048  }
 0x2f9   :  { %v637_v27 = vmul.f32 %v1575_v19, %v636_v23 }
 0x2fa   :  { %v613_v28 = vsub.f32 %v605_v26, %v609_v25 }
 0x2fb   :  { %v638_v30 = vmul.f32 0.5, %v637_v27 }
 0x2fc   :  { %v1577_v31 = vpop.eup %1576  ;;  %v621_v32 = vadd.f32 1e-05, %v613_v28 }
 0x2fd   :  { %v639_v36 = vsub.f32 1.5, %v638_v30  ;;  %v656_v37 = vmul.f32 %v1577_v31, %v624_v17  ;;  %vm662_vm15 = vweird.f32 %v1577_v31 }
 0x2fe   :  { %1578 = vrsqrt.f32 %v621_v32  ;;  %vm663_vm1 = vmor %vm661_vm0, %vm662_vm15  ;;  %vm631_vm3 = vweird.f32 %v621_v32 }
 0x2ff   :  { %v657_v33 = vmul.f32 %v1577_v31, %v656_v37  ;;  %v640_v34 = vmul.f32 %v1575_v19, %v639_v36 }
 0x301   :  { %v658_v42 = vmul.f32 0.5, %v657_v33  ;;  %v644_v35 = vsel %vm643_vm14, %v1575_v19, %v640_v34  ;;  %vm1307_vm14 = vcmask 1042432  }
 0x302   :  { %v666_v43 = vmul.f32 %v644_v35, %v618_v41 }
 0x303   :  { %v659_v38 = vsub.f32 1.5, %v658_v42 }
 0x304   :  { %v1579_v44 = vpop.eup %1578  ;;  %688 = vperm.xlu0 %1566, %v666_v43   ;;  %v674_v10 = vmul.f32 %v666_v43, %v1969_v62 }
 0x305   :  { %v660_v45 = vmul.f32 %v1577_v31, %v659_v38  ;;  %v626_v55 = vmul.f32 %v1579_v44, %v621_v32  ;;  %vm632_vm2 = vweird.f32 %v1579_v44 }
 0x306   :  { %vm633_vm4 = vmor %vm631_vm3, %vm632_vm2  ;;  %v678_v12 = vsub.f32 %v670_v11, %v674_v10  ;;  %vm1462_vm2 = vcmask 1043456  }
 0x307   :  { %v627_v57 = vmul.f32 %v1579_v44, %v626_v55  ;;  %v664_v58 = vsel %vm663_vm1, %v1577_v31, %v660_v45 }
 0x308   :  { %v668_v61 = vmul.f32 %v664_v58, %v620_v56 }
 0x309   :  { %v628_v39 = vmul.f32 0.5, %v627_v57 }
 0x30a   :  { %v676_v40 = vmul.f32 %v668_v61, %v604_v51 }
 0x30b   :  { %v629_v0 = vsub.f32 1.5, %v628_v39 }
 0x30c   :  { %v680_v3 = vsub.f32 %v672_v63, %v676_v40 }
 0x30d   :  { %v630_v15 = vmul.f32 %v1579_v44, %v629_v0 }
 0x30e   :  { %734 = vperm.xlu2 %1565, %v680_v3  }
 0x30f   :  { %v634_v7 = vsel %vm633_vm4, %v1579_v44, %v630_v15 }
 0x310   :  { %v665_v20 = vmul.f32 %v634_v7, %v617_v6 }
 0x312   :  { %683 = vperm.xlu1 %1567, %v665_v20   ;;  %v673_v9 = vmul.f32 %v665_v20, %v601_v16 }
 0x314   :  { %v677_v51 = vsub.f32 %v669_v22, %v673_v9 }
 0x316   :  { %719 = vperm.xlu2 %1565, %v677_v51  }
 0x31a   :  { %698 = vperm.xlu1 %1567, %v668_v61  }
 0x322   :  { %724 = vperm.xlu1 %1567, %v678_v12  }
 0x34e   :  { %v694_v13 = vpop.permute.xlu2 %693 }
 0x34f   :  { %v709_v18 = vmul.f32 %v694_v13, %v1905_v50  ;;  %v710_v19 = vmul.f32 %v694_v13, %v1907_v53  ;;  %v711_v16 = vmul.f32 %v694_v13, %v1915_v59  ;;  %v712_v21 = vmul.f32 %v694_v13, %v1917_v60 }
 0x368   :  { %v735_v14 = vpop.permute.xlu2 %734 }
 0x36a   :  { %v730_v17 = vpop.permute.xlu0 %729 }
 0x36b   :  { %v745_v24 = vadd.f32 %v730_v17, %v709_v18  ;;  %v746_v62 = vadd.f32 %v730_v17, %v710_v19  ;;  %v747_v25 = vadd.f32 %v730_v17, %v711_v16  ;;  %v748_v26 = vadd.f32 %v730_v17, %v712_v21 }
 0x36d   :  { %v761_v50 = vmax.f32 %v745_v24, 0.0  ;;  %v762_v32 = vmax.f32 %v746_v62, 0.0  ;;  %v763_v53 = vmax.f32 %v747_v25, 0.0  ;;  %v764_v36 = vmax.f32 %v748_v26, 0.0 }
 0x36f   :  { %v773_v35 = vpack.c.bf16 %v762_v32, %v761_v50 }
 0x370   :  { %v720_v59 = vpop.permute.xlu2 %719 }
 0x371   :  { %v801_v0 = vunpack.c.h.b16 %v773_v35 }
 0x376   :  { %v689_v43 = vpop.permute.xlu0 %688 }
 0x377   :  { %v707_v3 = vmul.f32 %v689_v43, %v1901_v5  ;;  %v708_v6 = vmul.f32 %v689_v43, %v1903_v49 }
 0x384   :  { %v684_v23 = vpop.permute.xlu1 %683 }
 0x385   :  { %v701_v27 = vmul.f32 %v684_v23, %v1889_v52  ;;  %v702_v28 = vmul.f32 %v684_v23, %v1891_v46  ;;  %v703_v30 = vmul.f32 %v684_v23, %v1893_v29  ;;  %v704_v31 = vmul.f32 %v684_v23, %v1895_v54 }
 0x386   :  { %v774_v54 = vpack.c.bf16 %v764_v36, %v763_v53 }
 0x387   :  { %v737_v37 = vadd.f32 %v720_v59, %v701_v27  ;;  %v738_v60 = vadd.f32 %v720_v59, %v702_v28  ;;  %v739_v33 = vadd.f32 %v720_v59, %v703_v30  ;;  %v740_v41 = vadd.f32 %v720_v59, %v704_v31 }
 0x388   :  { %v802_v22 = vunpack.c.l.b16 %v774_v54  ;;  %v803_v9 = vunpack.c.h.b16 %v774_v54 }
 0x389   :  { %v753_v56 = vmax.f32 %v737_v37, 0.0  ;;  %v754_v57 = vmax.f32 %v738_v60, 0.0  ;;  %v755_v58 = vmax.f32 %v739_v33, 0.0  ;;  %v756_v61 = vmax.f32 %v740_v41, 0.0  ;;  %v1558_v41 = vld [vmem:[%s2265_s7] sm:$0xff] }
 0x38b   :  { %v769_v51 = vpack.c.bf16 %v754_v57, %v753_v56  ;;  %v770_v10 = vpack.c.bf16 %v756_v61, %v755_v58 }
 0x38c   :  { %v699_v34 = vpop.permute.xlu1 %698 }
 0x38d   :  { %v713_v42 = vmul.f32 %v699_v34, %v1927_v47  ;;  %v714_v52 = vmul.f32 %v699_v34, %v1929_v1  ;;  %v715_v46 = vmul.f32 %v699_v34, %v1934_v4  ;;  %v716_v29 = vmul.f32 %v699_v34, %v1941_v8  ;;  %v1559_v34 = vld [vmem:[%s2266_s8] sm:$0xff] }
 0x38e   :  { %v705_v1 = vmul.f32 %v689_v43, %v1897_v48  ;;  %v706_v4 = vmul.f32 %v689_v43, %v1899_v2  ;;  %v800_v8 = vunpack.c.l.b16 %v773_v35  ;;  %v792_v27 = vunpack.c.l.b16 %v769_v51 }
 0x38f   :  { %v749_v38 = vadd.f32 %v735_v14, %v713_v42  ;;  %v750_v44 = vadd.f32 %v735_v14, %v714_v52  ;;  %v751_v45 = vadd.f32 %v735_v14, %v715_v46  ;;  %v752_v55 = vadd.f32 %v735_v14, %v716_v29 }
 0x390   :  { %v793_v28 = vunpack.c.h.b16 %v769_v51  ;;  %v794_v30 = vunpack.c.l.b16 %v770_v10  ;;  %v795_v31 = vunpack.c.h.b16 %v770_v10 }
 0x391   :  { %v765_v39 = vmax.f32 %v749_v38, 0.0  ;;  %v766_v63 = vmax.f32 %v750_v44, 0.0  ;;  %v767_v47 = vmax.f32 %v751_v45, 0.0  ;;  %v768_v40 = vmax.f32 %v752_v55, 0.0 }
 0x393   :  { %v775_v15 = vpack.c.bf16 %v766_v63, %v765_v39  ;;  %v776_v7 = vpack.c.bf16 %v768_v40, %v767_v47 }
 0x394   :  { %v725_v20 = vpop.permute.xlu1 %724 }
 0x395   :  { %v741_v11 = vadd.f32 %v725_v20, %v705_v1  ;;  %v742_v12 = vadd.f32 %v725_v20, %v706_v4  ;;  %v743_v13 = vadd.f32 %v725_v20, %v707_v3  ;;  %v744_v14 = vadd.f32 %v725_v20, %v708_v6 }
 0x396   :  { %v804_v48 = vunpack.c.l.b16 %v775_v15  ;;  %v805_v17 = vunpack.c.h.b16 %v775_v15  ;;  %v806_v2 = vunpack.c.l.b16 %v776_v7  ;;  %v807_v18 = vunpack.c.h.b16 %v776_v7 }
 0x397   :  { %v757_v19 = vmax.f32 %v741_v11, 0.0  ;;  %v758_v16 = vmax.f32 %v742_v12, 0.0  ;;  %v759_v5 = vmax.f32 %v743_v13, 0.0  ;;  %v760_v21 = vmax.f32 %v744_v14, 0.0 }
 0x398   :  { %v812_v49 = vpack.c.b16 %v804_v48, %v800_v8  ;;  %v813_v23 = vpack.c.b16 %v805_v17, %v801_v0  ;;  %v814_v24 = vpack.c.b16 %v806_v2, %v802_v22  ;;  %v815_v62 = vpack.c.b16 %v807_v18, %v803_v9 }
 0x399   :  { %v771_v25 = vpack.c.bf16 %v758_v16, %v757_v19  ;;  %v772_v26 = vpack.c.bf16 %v760_v21, %v759_v5 }
 0x39a   :  { %834 = vmatpush.bf16.msrb.mxu0 %v812_v49  ;;  %848 = vmatpush.bf16.msrb.mxu1 %v813_v23 }
 0x39b   :  { %862 = vmatpush.bf16.msrb.mxu2 %v814_v24  ;;  %876 = vmatpush.bf16.msrb.mxu3 %v815_v62  ;;  %v796_v50 = vunpack.c.l.b16 %v771_v25  ;;  %v797_v32 = vunpack.c.h.b16 %v771_v25  ;;  %v798_v53 = vunpack.c.l.b16 %v772_v26  ;;  %v799_v36 = vunpack.c.h.b16 %v772_v26 }
 0x39d   :  { %v808_v59 = vpack.c.b16 %v796_v50, %v792_v27  ;;  %v809_v37 = vpack.c.b16 %v797_v32, %v793_v28  ;;  %v810_v60 = vpack.c.b16 %v798_v53, %v794_v30  ;;  %v811_v33 = vpack.c.b16 %v799_v36, %v795_v31 }
 0x39f   :  { %835 = vmatpush.bf16.msrb.mxu0 %v808_v59  ;;  %849 = vmatpush.bf16.msrb.mxu1 %v809_v37 }
 0x3a0   :  { %863 = vmatpush.bf16.msrb.mxu2 %v810_v60  ;;  %877 = vmatpush.bf16.msrb.mxu3 %v811_v33 }
 0x3a2   :  { %1531 = vmatmul.msk.bf16.vlgmr.msrb.gmra.mxu0 %vm824_vm5, %v1558_v41  ;;  %1532 = vmatmul.msk.bf16.vlgmr.msrb.gmra.mxu1 %vm824_vm5, %v1558_v41 }
 0x3a3   :  { %899 = vmatpush.bf16.msra.mxu0 %v812_v49  ;;  %913 = vmatpush.bf16.msra.mxu1 %v813_v23 }
 0x3a4   :  { %927 = vmatpush.bf16.msra.mxu2 %v814_v24  ;;  %1534 = vmatmul.msk.bf16.vlgmr.msrb.gmra.mxu3 %vm824_vm5, %v1558_v41 }
 0x3a5   :  { %1533 = vmatmul.msk.bf16.vlgmr.msrb.gmra.mxu2 %vm824_vm5, %v1558_v41 }
 0x3a7   :  { %900 = vmatpush.bf16.msra.mxu0 %v808_v59  ;;  %914 = vmatpush.bf16.msra.mxu1 %v809_v37 }
 0x3a8   :  { %928 = vmatpush.bf16.msra.mxu2 %v810_v60 }
 0x3ab   :  { %901 = vmatpush.bf16.msra.mxu0 %v813_v23  ;;  %915 = vmatpush.bf16.msra.mxu1 %v814_v24 }
 0x3ac   :  { %929 = vmatpush.bf16.msra.mxu2 %v815_v62 }
 0x3af   :  { %902 = vmatpush.bf16.msra.mxu0 %v809_v37  ;;  %916 = vmatpush.bf16.msra.mxu1 %v810_v60 }
 0x3b0   :  { %930 = vmatpush.bf16.msra.mxu2 %v811_v33 }
 0x3b2   :  { %1539 = vmatmul.msk.bf16.vlgmr.msra.gmra.mxu0 %vm891_vm6, %v1559_v34  ;;  %1540 = vmatmul.msk.bf16.vlgmr.msra.gmra.mxu1 %vm891_vm6, %v1559_v34 }
 0x3b5   :  { %1541 = vmatmul.msk.bf16.vlgmr.msra.gmra.mxu2 %vm891_vm6, %v1559_v34 }
 0x41f   :  { %v2024_v42 = vpop.f32.mrf.mxu0  ;;  %v2026_v52 = vpop.f32.mrf.mxu1 }
 0x420   :  { %v953_v38 = vmul.f32 %v2024_v42, %v2024_v42  ;;  %v955_v56 = vmul.f32 %v2026_v52, %v2026_v52 }
 0x427   :  { %v2030_v29 = vpop.f32.mrf.mxu0  ;;  %v2032_v35 = vpop.f32.mrf.mxu1 }
 0x428   :  { %v2028_v46 = vpop.f32.mrf.mxu2  ;;  %v2052_v47 = vpop.f32.mrf.mxu3  ;;  %v960_v0 = vmul.f32 %v2030_v29, %v2030_v29  ;;  %v962_v51 = vmul.f32 %v2032_v35, %v2032_v35 }
 0x429   :  { %v957_v40 = vmul.f32 %v2028_v46, %v2028_v46  ;;  %v959_v15 = vmul.f32 %v2052_v47, %v2052_v47 }
 0x42f   :  { %v2036_v43 = vpop.f32.mrf.mxu0  ;;  %v2044_v55 = vpop.f32.mrf.mxu1 }
 0x430   :  { %v2034_v54 = vpop.f32.mrf.mxu2  ;;  %v937_v44 = vadd.f32 %v2036_v43, %v2024_v42  ;;  %v954_v45 = vmul.f32 %v2036_v43, %v2036_v43  ;;  %v956_v61 = vmul.f32 %v2044_v55, %v2044_v55  ;;  %v2086_v49 = vpop.f32.mrf.mxu3 }
 0x431   :  { %v964_v19 = vmul.f32 %v2034_v54, %v2034_v54  ;;  %v966_v26 = vmul.f32 %v2086_v49, %v2086_v49 }
 0x432   :  { %v967_v57 = vadd.f32 %v954_v45, %v953_v38  ;;  %v938_v58 = vadd.f32 %v937_v44, %v2026_v52 }
 0x434   :  { %v939_v39 = vadd.f32 %v938_v58, %v2044_v55  ;;  %v968_v63 = vadd.f32 %v967_v57, %v955_v56 }
 0x436   :  { %v969_v1 = vadd.f32 %v968_v63, %v956_v61  ;;  %v940_v8 = vadd.f32 %v939_v39, %v2028_v46 }
 0x437   :  { %v2061_v3 = vpop.f32.mrf.mxu0  ;;  %v2074_v10 = vpop.f32.mrf.mxu1 }
 0x438   :  { %v2056_v4 = vpop.f32.mrf.mxu2  ;;  %v945_v7 = vadd.f32 %v2061_v3, %v2030_v29  ;;  %v961_v20 = vmul.f32 %v2061_v3, %v2061_v3  ;;  %v970_v9 = vadd.f32 %v969_v1, %v957_v40  ;;  %v963_v17 = vmul.f32 %v2074_v10, %v2074_v10  ;;  %v991_v40 = vld [vmem:[%s2267_s9] sm:$0xff] }
 0x439   :  { %v958_v6 = vmul.f32 %v2056_v4, %v2056_v4  ;;  %v941_v22 = vadd.f32 %v940_v8, %v2056_v4 }
 0x43a   :  { %v975_v11 = vadd.f32 %v961_v20, %v960_v0  ;;  %v946_v12 = vadd.f32 %v945_v7, %v2032_v35  ;;  %v1017_v7 = vld [vmem:[%s2268_s10] sm:$0xff] }
 0x43b   :  { %v942_v13 = vadd.f32 %v941_v22, %v2052_v47  ;;  %v971_v14 = vadd.f32 %v970_v9, %v958_v6 }
 0x43c   :  { %v947_v48 = vadd.f32 %v946_v12, %v2074_v10  ;;  %v976_v2 = vadd.f32 %v975_v11, %v962_v51  ;;  %v992_v51 = vld [vmem:[%s2267_s9 + $0x8] sm:$0xff] }
 0x43d   :  { %943 = vadd.xlane.f32.xlu0 %v942_v13  ;;  %v972_v18 = vadd.f32 %v971_v14, %v959_v15  ;;  %v1018_v14 = vld [vmem:[%s2268_s10 + $0x8] sm:$0xff] }
 0x43e   :  { %v977_v16 = vadd.f32 %v976_v2, %v963_v17  ;;  %v948_v21 = vadd.f32 %v947_v48, %v2034_v54 }
 0x43f   :  { %973 = vadd.xlane.f32.xlu1 %v972_v18 }
 0x440   :  { %v2083_v5 = vpop.f32.mrf.mxu2  ;;  %v978_v62 = vadd.f32 %v977_v16, %v964_v19 }
 0x441   :  { %v965_v23 = vmul.f32 %v2083_v5, %v2083_v5  ;;  %v949_v24 = vadd.f32 %v948_v21, %v2083_v5 }
 0x443   :  { %v950_v25 = vadd.f32 %v949_v24, %v2086_v49  ;;  %v979_v27 = vadd.f32 %v978_v62, %v965_v23 }
 0x445   :  { %951 = vadd.xlane.f32.xlu2 %v950_v25  ;;  %v980_v28 = vadd.f32 %v979_v27, %v966_v26 }
 0x447   :  { %981 = vadd.xlane.f32.xlu0 %v980_v28 }
 0x4b0   :  { %v944_v30 = vpop.xlane.xlu0 %943 }
 0x4b1   :  { %v983_v31 = vmul.f32 0.0011160715, %v944_v30 }
 0x4b2   :  { %v974_v50 = vpop.xlane.xlu1 %973 }
 0x4b3   :  { %v987_v32 = vmul.f32 %v983_v31, %v983_v31  ;;  %v985_v53 = vmul.f32 0.0011160715, %v974_v50 }
 0x4b5   :  { %v989_v36 = vsub.f32 %v985_v53, %v987_v32 }
 0x4b7   :  { %v993_v59 = vadd.f32 1e-05, %v989_v36 }
 0x4b8   :  { %v952_v37 = vpop.xlane.xlu2 %951 }
 0x4b9   :  { %1580 = vrsqrt.f32 %v993_v59  ;;  %v984_v60 = vmul.f32 0.0011160715, %v952_v37  ;;  %vm1001_vm8 = vweird.f32 %v993_v59 }
 0x4ba   :  { %v982_v33 = vpop.xlane.xlu0 %981 }
 0x4bb   :  { %v988_v41 = vmul.f32 %v984_v60, %v984_v60  ;;  %v986_v34 = vmul.f32 0.0011160715, %v982_v33 }
 0x4bd   :  { %v990_v38 = vsub.f32 %v986_v34, %v988_v41 }
 0x4bf   :  { %v1581_v44 = vpop.eup %1580  ;;  %v994_v45 = vadd.f32 1e-05, %v990_v38 }
 0x4c0   :  { %v996_v56 = vmul.f32 %v1581_v44, %v993_v59  ;;  %vm1002_vm7 = vweird.f32 %v1581_v44 }
 0x4c1   :  { %1582 = vrsqrt.f32 %v994_v45  ;;  %vm1003_vm9 = vmor %vm1001_vm8, %vm1002_vm7  ;;  %vm1011_vm11 = vweird.f32 %v994_v45 }
 0x4c2   :  { %v997_v57 = vmul.f32 %v1581_v44, %v996_v56 }
 0x4c4   :  { %v998_v58 = vmul.f32 0.5, %v997_v57 }
 0x4c6   :  { %v999_v61 = vsub.f32 1.5, %v998_v58 }
 0x4c7   :  { %v1583_v39 = vpop.eup %1582 }
 0x4c8   :  { %v1006_v63 = vmul.f32 %v1583_v39, %v994_v45  ;;  %v1000_v1 = vmul.f32 %v1581_v44, %v999_v61  ;;  %vm1012_vm10 = vweird.f32 %v1583_v39 }
 0x4c9   :  { %vm1013_vm12 = vmor %vm1011_vm11, %vm1012_vm10 }
 0x4ca   :  { %v1007_v8 = vmul.f32 %v1583_v39, %v1006_v63  ;;  %v1004_v0 = vsel %vm1003_vm9, %v1581_v44, %v1000_v1 }
 0x4cb   :  { %v1015_v6 = vmul.f32 %v1004_v0, %v991_v40 }
 0x4cc   :  { %v1008_v15 = vmul.f32 0.5, %v1007_v8 }
 0x4cd   :  { %1025 = vperm.xlu2 %1565, %v1015_v6   ;;  %v1019_v20 = vmul.f32 %v1015_v6, %v983_v31 }
 0x4ce   :  { %v1009_v22 = vsub.f32 1.5, %v1008_v15 }
 0x4cf   :  { %v1021_v9 = vsub.f32 %v1017_v7, %v1019_v20 }
 0x4d0   :  { %v1010_v11 = vmul.f32 %v1583_v39, %v1009_v22 }
 0x4d1   :  { %1049 = vperm.xlu0 %1566, %v1021_v9  }
 0x4d2   :  { %v1014_v12 = vsel %vm1013_vm12, %v1583_v39, %v1010_v11 }
 0x4d3   :  { %v1016_v13 = vmul.f32 %v1014_v12, %v992_v51 }
 0x4d5   :  { %1030 = vperm.xlu1 %1567, %v1016_v13   ;;  %v1020_v48 = vmul.f32 %v1016_v13, %v984_v60 }
 0x4d7   :  { %v1022_v17 = vsub.f32 %v1018_v14, %v1020_v48 }
 0x4d9   :  { %1054 = vperm.xlu2 %1565, %v1022_v17  }
 0x527   :  { %v1026_v2 = vpop.permute.xlu2 %1025 }
 0x528   :  { %v1033_v18 = vmul.f32 %v1026_v2, %v2024_v42  ;;  %v1034_v19 = vmul.f32 %v1026_v2, %v2036_v43  ;;  %v1035_v16 = vmul.f32 %v1026_v2, %v2026_v52  ;;  %v1036_v21 = vmul.f32 %v1026_v2, %v2044_v55 }
 0x529   :  { %v1037_v23 = vmul.f32 %v1026_v2, %v2028_v46  ;;  %v1038_v24 = vmul.f32 %v1026_v2, %v2056_v4  ;;  %v1039_v50 = vmul.f32 %v1026_v2, %v2052_v47 }
 0x533   :  { %v1055_v60 = vpop.permute.xlu2 %1054 }
 0x543   :  { %v1050_v62 = vpop.permute.xlu0 %1049 }
 0x544   :  { %v1057_v25 = vadd.f32 %v1050_v62, %v1033_v18  ;;  %v1058_v26 = vadd.f32 %v1050_v62, %v1034_v19  ;;  %v1059_v27 = vadd.f32 %v1050_v62, %v1035_v16  ;;  %v1060_v28 = vadd.f32 %v1050_v62, %v1036_v21 }
 0x545   :  { %v1061_v30 = vadd.f32 %v1050_v62, %v1037_v23  ;;  %v1062_v31 = vadd.f32 %v1050_v62, %v1038_v24  ;;  %v1063_v55 = vadd.f32 %v1050_v62, %v1039_v50 }
 0x546   :  { %v1071_v42 = vmax.f32 %v1057_v25, 0.0  ;;  %v1072_v32 = vmax.f32 %v1058_v26, 0.0  ;;  %v1073_v53 = vmax.f32 %v1059_v27, 0.0  ;;  %v1074_v52 = vmax.f32 %v1060_v28, 0.0  ;;  %v1093_v25 = vld [vmem:[%s2269_s11] sm:$0x3] }
 0x547   :  { %v1031_v43 = vpop.permute.xlu1 %1030  ;;  %v1075_v36 = vmax.f32 %v1061_v30, 0.0  ;;  %v1076_v34 = vmax.f32 %v1062_v31, 0.0  ;;  %v1077_v58 = vmax.f32 %v1063_v55, 0.0  ;;  %v1225_v30 = vld [vmem:[%s2270_s12] sm:$0x3] }
 0x548   :  { %v1040_v46 = vmul.f32 %v1031_v43, %v2030_v29  ;;  %v1041_v4 = vmul.f32 %v1031_v43, %v2061_v3  ;;  %v1042_v59 = vmul.f32 %v1031_v43, %v2032_v35  ;;  %v1043_v37 = vmul.f32 %v1031_v43, %v2074_v10 }
 0x549   :  { %v1044_v33 = vmul.f32 %v1031_v43, %v2034_v54  ;;  %v1045_v47 = vmul.f32 %v1031_v43, %v2083_v5  ;;  %v1085_v41 = vpack.c.bf16 %v1072_v32, %v1071_v42  ;;  %v1086_v57 = vpack.c.bf16 %v1074_v52, %v1073_v53 }
 0x54a   :  { %v1064_v38 = vadd.f32 %v1055_v60, %v1040_v46  ;;  %v1065_v44 = vadd.f32 %v1055_v60, %v1041_v4  ;;  %v1066_v45 = vadd.f32 %v1055_v60, %v1042_v59  ;;  %v1067_v56 = vadd.f32 %v1055_v60, %v1043_v37 }
 0x54b   :  { %v1068_v35 = vadd.f32 %v1055_v60, %v1044_v33  ;;  %v1069_v63 = vadd.f32 %v1055_v60, %v1045_v47  ;;  %v1087_v10 = vpack.c.bf16 %v1076_v34, %v1075_v36  ;;  %v1046_v40 = vmul.f32 %v1031_v43, %v2086_v49 }
 0x54c   :  { %v1078_v29 = vmax.f32 %v1064_v38, 0.0  ;;  %v1079_v61 = vmax.f32 %v1065_v44, 0.0  ;;  %v1080_v3 = vmax.f32 %v1066_v45, 0.0  ;;  %v1081_v39 = vmax.f32 %v1067_v56, 0.0 }
 0x54d   :  { %v1102_v1 = vunpack.c.l.b16 %v1085_v41  ;;  %v1103_v5 = vunpack.c.h.b16 %v1085_v41  ;;  %v1104_v0 = vunpack.c.l.b16 %v1086_v57  ;;  %v1105_v6 = vunpack.c.h.b16 %v1086_v57 }
 0x54e   :  { %v1089_v54 = vpack.c.bf16 %v1079_v61, %v1078_v29  ;;  %v1090_v8 = vpack.c.bf16 %v1081_v39, %v1080_v3  ;;  %v1082_v15 = vmax.f32 %v1068_v35, 0.0  ;;  %v1083_v7 = vmax.f32 %v1069_v63, 0.0 }
 0x54f   :  { %v1106_v12 = vunpack.c.l.b16 %v1087_v10  ;;  %v1070_v13 = vadd.f32 %v1055_v60, %v1046_v40  ;;  %v1088_v14 = vpack.c.bf16 %v1077_v58, %v1077_v58  ;;  %v1107_v19 = vunpack.c.h.b16 %v1087_v10 }
 0x550   :  { %v1109_v20 = vunpack.c.l.b16 %v1089_v54  ;;  %v1110_v22 = vunpack.c.h.b16 %v1089_v54  ;;  %v1111_v9 = vunpack.c.l.b16 %v1090_v8  ;;  %v1112_v51 = vunpack.c.h.b16 %v1090_v8 }
 0x551   :  { %v1091_v11 = vpack.c.bf16 %v1083_v7, %v1082_v15  ;;  %v1084_v21 = vmax.f32 %v1070_v13, 0.0  ;;  %v1108_v26 = vunpack.c.l.b16 %v1088_v14 }
 0x552   :  { %v1116_v48 = vpack.c.b16 %v1109_v20, %v1102_v1  ;;  %v1117_v17 = vpack.c.b16 %v1110_v22, %v1103_v5  ;;  %v1118_v2 = vpack.c.b16 %v1111_v9, %v1104_v0  ;;  %v1119_v49 = vpack.c.b16 %v1112_v51, %v1105_v6 }
 0x553   :  { %v1113_v18 = vunpack.c.l.b16 %v1091_v11  ;;  %v1114_v16 = vunpack.c.h.b16 %v1091_v11  ;;  %v1092_v62 = vpack.c.bf16 %v1084_v21, %v1084_v21 }
 0x554   :  { %1141 = vmatpush.bf16.msra.mxu3 %v1116_v48  ;;  %1154 = vmatpush.bf16.msrb.mxu0 %v1117_v17 }
 0x555   :  { %1167 = vmatpush.bf16.msrb.mxu1 %v1118_v2  ;;  %1180 = vmatpush.bf16.msrb.mxu2 %v1119_v49  ;;  %v1120_v23 = vpack.c.b16 %v1113_v18, %v1106_v12  ;;  %v1121_v24 = vpack.c.b16 %v1114_v16, %v1107_v19  ;;  %v1115_v27 = vunpack.c.l.b16 %v1092_v62 }
 0x557   :  { %1542 = vmatmul.msk.bf16.vlgmr.msra.gmra.mxu3 %vm1130_vm13, %v1093_v25  ;;  %1543 = vmatmul.msk.bf16.vlgmr.msrb.gmra.mxu0 %vm1130_vm13, %v1093_v25  ;;  %v1122_v28 = vpack.c.b16 %v1115_v27, %v1108_v26 }
 0x558   :  { %1193 = vmatpush.bf16.msrb.mxu3 %v1120_v23  ;;  %1206 = vmatpush.bf16.msra.mxu0 %v1121_v24 }
 0x559   :  { %1235 = vmatpush.bf16.msra.mxu2 %v1116_v48  ;;  %1544 = vmatmul.msk.bf16.vlgmr.msrb.gmra.mxu1 %vm1130_vm13, %v1093_v25 }
 0x55a   :  { %1219 = vmatpush.bf16.msra.mxu1 %v1122_v28  ;;  %1545 = vmatmul.msk.bf16.vlgmr.msrb.gmra.mxu2 %vm1130_vm13, %v1093_v25 }
 0x55c   :  { %1248 = vmatpush.bf16.msra.mxu3 %v1117_v17  ;;  %1261 = vmatpush.bf16.msrb.mxu0 %v1118_v2 }
 0x55d   :  { %1236 = vmatpush.bf16.msra.mxu2 %v1117_v17 }
 0x55e   :  { %1274 = vmatpush.bf16.msrb.mxu1 %v1119_v49 }
 0x560   :  { %1249 = vmatpush.bf16.msra.mxu3 %v1118_v2  ;;  %1262 = vmatpush.bf16.msrb.mxu0 %v1119_v49 }
 0x561   :  { %1287 = vmatpush.bf16.msrb.mxu2 %v1120_v23 }
 0x562   :  { %1275 = vmatpush.bf16.msrb.mxu1 %v1120_v23 }
 0x565   :  { %1288 = vmatpush.bf16.msrb.mxu2 %v1121_v24 }
 0x567   :  { %1546 = vmatmul.msk.bf16.vlgmr.msrb.gmra.mxu3 %vm1130_vm13, %v1093_v25  ;;  %1547 = vmatmul.msk.bf16.vlgmr.msra.gmra.mxu0 %vm1130_vm13, %v1093_v25 }
 0x568   :  { %1300 = vmatpush.bf16.msrb.mxu3 %v1121_v24 }
 0x569   :  { %1548 = vmatmul.msk.bf16.vlgmr.msra.gmra.mxu1 %vm1130_vm13, %v1093_v25 }
 0x56a   :  { %1549 = vmatmul.msk.bf16.vlgmr.msra.gmra.mxu2 %vm824_vm5, %v1225_v30 }
 0x56c   :  { %1301 = vmatpush.bf16.msrb.mxu3 %v1122_v28 }
 0x577   :  { %1550 = vmatmul.msk.bf16.vlgmr.msra.gmra.mxu3 %vm824_vm5, %v1225_v30  ;;  %1551 = vmatmul.msk.bf16.vlgmr.msrb.gmra.mxu0 %vm824_vm5, %v1225_v30 }
 0x579   :  { %1552 = vmatmul.msk.bf16.vlgmr.msrb.gmra.mxu1 %vm824_vm5, %v1225_v30 }
 0x57a   :  { %1553 = vmatmul.msk.bf16.vlgmr.msrb.gmra.mxu2 %vm824_vm5, %v1225_v30 }
 0x587   :  { %1554 = vmatmul.msk.bf16.vlgmr.msrb.gmra.mxu3 %vm824_vm5, %v1225_v30 }
 0x5d4   :  { %v2139_v31 = vpop.f32.mrf.mxu0 }
 0x5d5   :  { %v1337_v61 = vmul.f32 %v2139_v31, %v2139_v31  ;;  %v1311_v39 = vsel %vm1307_vm14, %v2139_v31, 0.0 }
 0x5d6   :  { %v2141_v50 = vpop.f32.mrf.mxu1 }
 0x5d7   :  { %v1339_v35 = vmul.f32 %v2141_v50, %v2141_v50  ;;  %v1351_v40 = vsel %vm1307_vm14, %v1337_v61, 0.0  ;;  %v1315_v15 = vsel %vm1307_vm14, %v2141_v50, 0.0 }
 0x5d9   :  { %v1355_v13 = vsel %vm1307_vm14, %v1339_v35, 0.0 }
 0x5da   :  { %v2143_v42 = vpop.f32.mrf.mxu3 }
 0x5db   :  { %v1335_v41 = vmul.f32 %v2143_v42, %v2143_v42  ;;  %v1308_v44 = vsel %vm1307_vm14, %v2143_v42, 0.0 }
 0x5dc   :  { %v1158_v32 = vpop.f32.mrf.mxu0 }
 0x5dd   :  { %v2145_v43 = vpop.f32.mrf.mxu2  ;;  %v1348_v29 = vsel %vm1307_vm14, %v1335_v41, 0.0 }
 0x5de   :  { %v1171_v53 = vpop.f32.mrf.mxu1  ;;  %v1341_v12 = vmul.f32 %v2145_v43, %v2145_v43  ;;  %v1319_v49 = vsel %vm1307_vm14, %v2145_v43, 0.0 }
 0x5e0   :  { %v1359_v23 = vsel %vm1307_vm14, %v1341_v12, 0.0 }
 0x5e2   :  { %v1145_v52 = vpop.f32.mrf.mxu3 }
 0x5e4   :  { %v2147_v36 = vpop.f32.mrf.mxu0 }
 0x5e5   :  { %v1184_v55 = vpop.f32.mrf.mxu2  ;;  %v1327_v41 = vsel %vm1307_vm14, %v2147_v36, 0.0 }
 0x5e6   :  { %v2149_v46 = vpop.f32.mrf.mxu1 }
 0x5e7   :  { %v1331_v35 = vsel %vm1307_vm14, %v2149_v46, 0.0 }
 0x5ea   :  { %v2151_v4 = vpop.f32.mrf.mxu3 }
 0x5eb   :  { %v1343_v24 = vmul.f32 %v2151_v4, %v2151_v4  ;;  %v1323_v28 = vsel %vm1307_vm14, %v2151_v4, 0.0 }
 0x5ec   :  { %v1210_v59 = vpop.f32.mrf.mxu0 }
 0x5ed   :  { %v2153_v37 = vpop.f32.mrf.mxu2  ;;  %v1363_v55 = vsel %vm1307_vm14, %v1343_v24, 0.0  ;;  %v1345_v59 = vmul.f32 %v2147_v36, %v2147_v36 }
 0x5ee   :  { %v1223_v60 = vpop.f32.mrf.mxu1  ;;  %v1336_v33 = vmul.f32 %v2153_v37, %v2153_v37  ;;  %v1309_v34 = vsel %vm1307_vm14, %v2153_v37, 0.0 }
 0x5ef   :  { %v1310_v58 = vadd.f32 %v1309_v34, %v1308_v44 }
 0x5f0   :  { %v1349_v45 = vsel %vm1307_vm14, %v1336_v33, 0.0 }
 0x5f1   :  { %v1350_v3 = vadd.f32 %v1349_v45, %v1348_v29  ;;  %v1312_v10 = vadd.f32 %v1311_v39, %v1310_v58  ;;  %v1347_v58 = vmul.f32 %v2149_v46, %v2149_v46 }
 0x5f2   :  { %v1197_v47 = vpop.f32.mrf.mxu3 }
 0x5f3   :  { %v1352_v0 = vadd.f32 %v1351_v40, %v1350_v3 }
 0x5f4   :  { %v2161_v38 = vpop.f32.mrf.mxu0 }
 0x5f5   :  { %v1240_v56 = vpop.f32.mrf.mxu2  ;;  %v1340_v5 = vmul.f32 %v2161_v38, %v2161_v38  ;;  %v1317_v20 = vsel %vm1307_vm14, %v2161_v38, 0.0 }
 0x5f6   :  { %v2166_v57 = vpop.f32.mrf.mxu1  ;;  %v1367_v56 = vsel %vm1307_vm14, %v1345_v59, 0.0 }
 0x5f7   :  { %v1357_v14 = vsel %vm1307_vm14, %v1340_v5, 0.0  ;;  %v1342_v48 = vmul.f32 %v2166_v57, %v2166_v57  ;;  %v1321_v18 = vsel %vm1307_vm14, %v2166_v57, 0.0 }
 0x5f9   :  { %v1361_v62 = vsel %vm1307_vm14, %v1342_v48, 0.0 }
 0x5fa   :  { %v2175_v63 = vpop.f32.mrf.mxu3 }
 0x5fb   :  { %v1313_v54 = vsel %vm1307_vm14, %v2175_v63, 0.0  ;;  %v1338_v1 = vmul.f32 %v2175_v63, %v2175_v63 }
 0x5fc   :  { %v1314_v8 = vadd.f32 %v1313_v54, %v1312_v10  ;;  %v1266_v6 = vpop.f32.mrf.mxu0 }
 0x5fd   :  { %v1353_v7 = vsel %vm1307_vm14, %v1338_v1, 0.0  ;;  %v2189_v22 = vpop.f32.mrf.mxu2  ;;  %v1371_v1 = vsel %vm1307_vm14, %v1347_v58, 0.0 }
 0x5fe   :  { %v1279_v9 = vpop.f32.mrf.mxu1  ;;  %v1354_v51 = vadd.f32 %v1353_v7, %v1352_v0  ;;  %v1316_v11 = vadd.f32 %v1315_v15, %v1314_v8  ;;  %v1344_v25 = vmul.f32 %v2189_v22, %v2189_v22  ;;  %v1325_v30 = vsel %vm1307_vm14, %v2189_v22, 0.0 }
 0x600   :  { %v1318_v17 = vadd.f32 %v1317_v20, %v1316_v11  ;;  %v1356_v2 = vadd.f32 %v1355_v13, %v1354_v51  ;;  %v1365_v60 = vsel %vm1307_vm14, %v1344_v25, 0.0 }
 0x602   :  { %v1358_v19 = vadd.f32 %v1357_v14, %v1356_v2  ;;  %v1253_v16 = vpop.f32.mrf.mxu3  ;;  %v1320_v21 = vadd.f32 %v1319_v49, %v1318_v17  ;;  %v1379_v17 = vld [vmem:[%s2271_s13] sm:$0x7]  ;;  %s1668_s13 = smov [#allocation5]  }
 0x603   :  { %v1392_v16 = vld [vmem:[%s2272_s14] sm:$0x7]  ;;  %s1487_s14 = sshll.u32 %s1668_s13, 4  ;;  %s1488_s14 = int_to_ptr.vmem [resolvable:$true] %s1487_s14 }
 0x604   :  { %v1322_v26 = vadd.f32 %v1321_v18, %v1320_v21  ;;  %v1360_v27 = vadd.f32 %v1359_v23, %v1358_v19 }
 0x605   :  { %v1292_v32 = vpop.f32.mrf.mxu2 }
 0x606   :  { %v1362_v53 = vadd.f32 %v1361_v62, %v1360_v27  ;;  %v1324_v52 = vadd.f32 %v1323_v28, %v1322_v26 }
 0x608   :  { %v1326_v33 = vadd.f32 %v1325_v30, %v1324_v52  ;;  %v1364_v47 = vadd.f32 %v1363_v55, %v1362_v53 }
 0x60a   :  { %v1366_v34 = vadd.f32 %v1365_v60, %v1364_v47  ;;  %v2217_v44 = vpop.f32.mrf.mxu3  ;;  %v1328_v45 = vadd.f32 %v1327_v41, %v1326_v33 }
 0x60b   :  { %v1329_v29 = vsel %vm1307_vm14, %v2217_v44, 0.0  ;;  %v1346_v61 = vmul.f32 %v2217_v44, %v2217_v44 }
 0x60c   :  { %v1330_v3 = vadd.f32 %v1329_v29, %v1328_v45  ;;  %v1368_v39 = vadd.f32 %v1367_v56, %v1366_v34 }
 0x60d   :  { %v1369_v10 = vsel %vm1307_vm14, %v1346_v61, 0.0 }
 0x60e   :  { %v1332_v40 = vadd.f32 %v1331_v35, %v1330_v3  ;;  %v1370_v54 = vadd.f32 %v1369_v10, %v1368_v39 }
 0x610   :  { %1333 = vadd.xlane.f32.xlu0 %v1332_v40  ;;  %v1372_v5 = vadd.f32 %v1371_v1, %v1370_v54 }
 0x612   :  { %1373 = vadd.xlane.f32.xlu1 %v1372_v5  ;;  %v1305_v8 = vpop.f32.mrf.mxu3 }
 0x683   :  { %v1334_v0 = vpop.xlane.xlu0 %1333 }
 0x684   :  { %v1375_v6 = vmul.f32 0.00060096156, %v1334_v0 }
 0x685   :  { %v1374_v15 = vpop.xlane.xlu1 %1373 }
 0x686   :  { %v1377_v7 = vmul.f32 %v1375_v6, %v1375_v6  ;;  %v1376_v20 = vmul.f32 0.00060096156, %v1374_v15 }
 0x688   :  { %v1378_v9 = vsub.f32 %v1376_v20, %v1377_v7 }
 0x68a   :  { %v1380_v51 = vadd.f32 1e-05, %v1378_v9 }
 0x68c   :  { %1584 = vrsqrt.f32 %v1380_v51  ;;  %vm1387_vm0 = vweird.f32 %v1380_v51 }
 0x692   :  { %v1585_v11 = vpop.eup %1584 }
 0x693   :  { %v1382_v12 = vmul.f32 %v1585_v11, %v1380_v51  ;;  %vm1388_vm15 = vweird.f32 %v1585_v11 }
 0x694   :  { %vm1389_vm1 = vmor %vm1387_vm0, %vm1388_vm15 }
 0x695   :  { %v1383_v13 = vmul.f32 %v1585_v11, %v1382_v12 }
 0x697   :  { %v1384_v14 = vmul.f32 0.5, %v1383_v13 }
 0x699   :  { %v1385_v48 = vsub.f32 1.5, %v1384_v14 }
 0x69b   :  { %v1386_v2 = vmul.f32 %v1585_v11, %v1385_v48 }
 0x69d   :  { %v1390_v49 = vsel %vm1389_vm1, %v1585_v11, %v1386_v2 }
 0x69e   :  { %v1391_v18 = vmul.f32 %v1390_v49, %v1379_v17 }
 0x6a0   :  { %1397 = vperm.xlu2 %1565, %v1391_v18   ;;  %v1393_v19 = vmul.f32 %v1391_v18, %v1375_v6 }
 0x6a2   :  { %v1394_v21 = vsub.f32 %v1392_v16, %v1393_v19 }
 0x6a8   :  { %1415 = vperm.xlu2 %1565, %v1394_v21  }
 0x6fa   :  { %v1398_v23 = vpop.permute.xlu2 %1397 }
 0x6fb   :  { %v1401_v24 = vmul.f32 %v1398_v23, %v2153_v37  ;;  %v1400_v25 = vmul.f32 %v1398_v23, %v2143_v42  ;;  %v1403_v26 = vmul.f32 %v1398_v23, %v2175_v63  ;;  %v1402_v28 = vmul.f32 %v1398_v23, %v2139_v31 }
 0x6fc   :  { %v1405_v32 = vmul.f32 %v1398_v23, %v2161_v38  ;;  %v1404_v52 = vmul.f32 %v1398_v23, %v2141_v50  ;;  %v1407_v59 = vmul.f32 %v1398_v23, %v2166_v57  ;;  %v1406_v37 = vmul.f32 %v1398_v23, %v2145_v43 }
 0x6fd   :  { %v1409_v42 = vmul.f32 %v1398_v23, %v2189_v22  ;;  %v1408_v31 = vmul.f32 %v1398_v23, %v2151_v4  ;;  %v1411_v38 = vmul.f32 %v1398_v23, %v2217_v44  ;;  %v1412_v57 = vmul.f32 %v1398_v23, %v2149_v46 }
 0x6fe   :  { %v1410_v43 = vmul.f32 %v1398_v23, %v2147_v36 }
 0x702   :  { %v1416_v62 = vpop.permute.xlu2 %1415 }
 0x703   :  { %v1419_v27 = vadd.f32 %v1416_v62, %v1401_v24  ;;  %v1418_v30 = vadd.f32 %v1416_v62, %v1400_v25  ;;  %v1421_v53 = vadd.f32 %v1416_v62, %v1403_v26  ;;  %v1420_v55 = vadd.f32 %v1416_v62, %v1402_v28 }
 0x704   :  { %v1423_v60 = vadd.f32 %v1416_v62, %v1405_v32  ;;  %v1422_v33 = vadd.f32 %v1416_v62, %v1404_v52  ;;  %v1425_v63 = vadd.f32 %v1416_v62, %v1407_v59  ;;  %v1424_v47 = vadd.f32 %v1416_v62, %v1406_v37 }
 0x705   :  { %1586 = vtanh.f32 %v1419_v27  ;;  %v1427_v50 = vadd.f32 %v1416_v62, %v1409_v42  ;;  %v1426_v41 = vadd.f32 %v1416_v62, %v1408_v31  ;;  %v1429_v45 = vadd.f32 %v1416_v62, %v1411_v38 }
 0x706   :  { %1588 = vtanh.f32 %v1418_v30  ;;  %v1430_v56 = vadd.f32 %v1416_v62, %v1412_v57  ;;  %v1428_v29 = vadd.f32 %v1416_v62, %v1410_v43 }
 0x707   :  { %1590 = vtanh.f32 %v1421_v53 }
 0x708   :  { %1592 = vtanh.f32 %v1420_v55 }
 0x709   :  { %1594 = vtanh.f32 %v1423_v60 }
 0x70a   :  { %1596 = vtanh.f32 %v1422_v33 }
 0x70b   :  { %v1587_v34 = vpop.eup %1586  ;;  %1598 = vtanh.f32 %v1425_v63 }
 0x70c   :  { %v1589_v22 = vpop.eup %1588  ;;  %1600 = vtanh.f32 %v1424_v47  ;;  %v1456_v4 = vrot.slane %v1587_v34, 4 }
 0x70d   :  { %v1591_v58 = vpop.eup %1590  ;;  %1602 = vtanh.f32 %v1427_v50 }
 0x70e   :  { %v1593_v44 = vpop.eup %1592  ;;  %1604 = vtanh.f32 %v1426_v41  ;;  %v1457_v61 = vrot.slane %v1591_v58, 4  ;;  %v1463_v46 = vsel %vm1462_vm2, %v1589_v22, %v1456_v4 }
 0x70f   :  { %v1595_v3 = vpop.eup %1594  ;;  %1606 = vtanh.f32 %v1429_v45  ;;  %1475 = vst [vmem:[#allocation5] sm:$0x77] %v1463_v46 }
 0x710   :  { %v1597_v39 = vpop.eup %1596  ;;  %1608 = vtanh.f32 %v1430_v56  ;;  %v1458_v36 = vrot.slane %v1595_v3, 4  ;;  %v1464_v35 = vsel %vm1462_vm2, %v1593_v44, %v1457_v61 }
 0x711   :  { %v1599_v10 = vpop.eup %1598  ;;  %1610 = vtanh.f32 %v1428_v29  ;;  %1476 = vst [vmem:[#allocation5 + $0x8] sm:$0x77] %v1464_v35 }
 0x712   :  { %v1601_v40 = vpop.eup %1600  ;;  %v1459_v54 = vrot.slane %v1599_v10, 4  ;;  %v1465_v1 = vsel %vm1462_vm2, %v1597_v39, %v1458_v36 }
 0x713   :  { %v1603_v5 = vpop.eup %1602  ;;  %1477 = vst [vmem:[#allocation5 + $0x10] sm:$0x77] %v1465_v1 }
 0x714   :  { %v1605_v8 = vpop.eup %1604  ;;  %v1460_v0 = vrot.slane %v1603_v5, 4  ;;  %v1466_v6 = vsel %vm1462_vm2, %v1601_v40, %v1459_v54 }
 0x715   :  { %v1607_v15 = vpop.eup %1606  ;;  %1478 = vst [vmem:[#allocation5 + $0x18] sm:$0x77] %v1466_v6 }
 0x716   :  { %v1609_v7 = vpop.eup %1608  ;;  %v1461_v20 = vrot.slane %v1607_v15, 4  ;;  %v1467_v9 = vsel %vm1462_vm2, %v1605_v8, %v1460_v0 }
 0x717   :  { %v1611_v51 = vpop.eup %1610  ;;  %1479 = vst [vmem:[#allocation5 + $0x20] sm:$0x77] %v1467_v9 }
 0x718   :  { %v1468_v11 = vsel %vm1462_vm2, %v1611_v51, %v1461_v20  ;;  %1481 = vst [vmem:[#allocation5 + $0x30] sm:$0x7] %v1609_v7 }
 0x719   :  { %1480 = vst [vmem:[#allocation5 + $0x28] sm:$0x77] %v1468_v11 }
 0x71a   :  { %1492 = dma.vmem_to_hbm [thread:$0]  %s1488_s14, 832, %s1490_s27, [#allocation4]  }
 0x71b   :  { %1662 = dma.done.wait [#allocation4], 832  }
 0x71c   :  { %1663 = vsyncadd [#allocation4], 4294966464 }
 0x71d   :  { %1497 = vsyncpa [#allocation3], 1 }
 0x71e   :  { %1498 = vsyncpa [#allocation4], 1 }

</bundles_post_ra>
